<compile_context>
chip_gen: v6e
topology: v6e:2x2x1
jax: 0.10.0
libtpu: 0.0.40
codegen_flags: <defaults>
</compile_context>

<pallas_src>
import jax
import jax.numpy as jnp
import numpy as np
from jax.experimental import pallas as pl
from jax.experimental.pallas import tpu as pltpu

WORD_KERNEL = 15   # word_conv kernel_size=(15, 1) -> title_length must be 15
NEWS_KERNEL = 35   # news_conv kernel_size=(35, 1) -> history_length must be 35


def _pick_batch_tile(batch):
    """Largest Bt in {8,4,2,1} dividing batch while keeping >= 2 grid steps.

    >= 2 steps lets the grid split across both TensorCores on v7x; the extra
    pipeline step costs ~0.35us on single-TC v5e/v6e, negligible now that each
    step is one consolidated matmul chain.
    """
    for bt in (8, 4, 2, 1):
        if batch % bt == 0 and batch // bt >= 2:
            return bt
    return 1


def _make_kernel(bt, H, C, TW, UC):
    """Build the Pallas kernel closure for static shapes."""
    NT = H + C

    def kernel(ids_ref, rep_ref, vgc_ref, bcrow_ref, wflat_ref, pk_ref, out_ref):
        # ids_ref  : (bt, NT, T) f32  word ids offset by t*W (exact integers)
        # rep_ref  : (T, TW)     f32  rep[t, k] = 1.0 iff k // W == t
        # vgc_ref  : (TW, WC*E)  f32  fused gather + word-conv weight  wc (x) emb
        # bcrow_ref: (1, WC*E)   f32  word-conv bias broadcast over E
        # wflat_ref: (WC*E, E)   f32  word_flat weight  wf (x) I_E
        # pk_ref   : (UC+2, H+2) f32  packed news-stage params
        # out_ref  : (bt, 1, C)  f32  softmax probabilities
        rep = rep_ref[...]
        vgc = vgc_ref[...]
        bcrow = bcrow_ref[...]
        wflat = wflat_ref[...]
        pk = pk_ref[...]

        wn = pk[0:UC, 0:H]              # (UC, H)  news_conv weight
        bn = pk[0:UC, H:H + 1]          # (UC, 1)  news_conv bias
        wu_row = pk[UC:UC + 1, 0:UC]    # (1, UC)  user_flat weight
        bf = pk[UC + 1:UC + 2, 0:1]     # (1, 1)   word_flat bias
        bu = pk[UC + 1:UC + 2, 1:2]     # (1, 1)   user_flat bias

        # Hoisted out of the batch-tile loop: lane index for the one-hot compare.
        kio = jax.lax.broadcasted_iota(jnp.int32, (NT, TW), 1).astype(jnp.float32)

        for i in range(bt):             # static unroll; bt is small
            ids = ids_ref[i]            # (NT, T)  values: word_id + t*W

            # Broadcast position t's id across its W lanes (tiny MXU matmul
            # against the constant 0/1 matrix), then compare with the lane
            # index -> joint one-hot over (position, word).
            idrep = jnp.dot(ids, rep, preferred_element_type=jnp.float32)   # (NT, TW)
            oh = (jnp.abs(idrep - kio) < 0.5).astype(jnp.float32)           # (NT, TW)

            # Fused embedding gather + Conv2d(1, WC, (T,1)) + bias + ReLU.
            conv = jnp.dot(oh, vgc, preferred_element_type=jnp.float32) + bcrow
            conv = jnp.maximum(conv, 0.0)                                   # (NT, WC*E)

            # word_flat: Linear(WC, 1) applied per embedding lane.
            title = jnp.dot(conv, wflat, preferred_element_type=jnp.float32) + bf
            t_clk = title[0:H, :]                                           # (H, E)
            t_cnd = title[H:H + C, :]                                       # (C, E)

            # news conv (Conv2d(1, UC, (H,1))) + ReLU + user_flat Linear(UC,1).
            u = jnp.dot(wn, t_clk, preferred_element_type=jnp.float32) + bn  # (UC, E)
            u = jnp.maximum(u, 0.0)
            user = jnp.dot(wu_row, u, preferred_element_type=jnp.float32) + bu  # (1, E)

            # Candidate scores (user . title_cnd) + exact softmax over C.
            scores = jax.lax.dot_general(
                user, t_cnd, (((1,), (1,)), ((), ())),
                preferred_element_type=jnp.float32)                         # (1, C)
            m = jnp.max(scores, axis=1, keepdims=True)
            ex = jnp.exp(scores - m)
            s = jnp.sum(ex, axis=1, keepdims=True)
            out_ref[i] = ex / s                                             # (1, C)

    return kernel


@jax.jit
def double_cnn_forward(clicked, candidates, params):
    emb, wc, bc, wf, bf, wn, bn, wu, bu = params
    B, H, T = clicked.shape
    _, C, _ = candidates.shape
    W, E = emb.shape
    WC = wc.shape[0]
    UC = wn.shape[0]
    assert T == WORD_KERNEL and H == NEWS_KERNEL
    NT, TW, CE = H + C, T * W, WC * E

    # TODO(synk): F.dropout(p=0.2) (active by default in F.dropout) omitted for
    # deterministic inference semantics.

    emb = emb.astype(jnp.float32)
    wc = wc.astype(jnp.float32)

    # ---- XLA-side precompute (tiny, once per call, outside the kernel) ----
    # Word ids, clamped like jnp.take / torch, offset by t*W so one one-hot over
    # T*W classes encodes (position, word) jointly; clicked and candidate titles
    # of a batch element share one block.
    titles = jnp.concatenate([clicked, candidates], axis=1)          # (B, NT, T)
    titles = jnp.clip(titles, 0, W - 1)
    offs = (jnp.arange(T, dtype=jnp.int32) * W)[None, None, :]
    ids = (titles + offs).astype(jnp.float32)                        # exact ints

    # rep[t, k] = 1 iff k // W == t : lane-broadcast matrix for the one-hot build.
    kk = jnp.arange(TW, dtype=jnp.int32)
    rep = (kk[None, :] // W ==
           jnp.arange(T, dtype=jnp.int32)[:, None]).astype(jnp.float32)   # (T, TW)

    # Fused gather + word-conv weight and its bias row.
    vgc = jnp.einsum('ct,we->twce', wc, emb).reshape(TW, CE)         # (TW, CE)
    bcrow = jnp.repeat(bc.astype(jnp.float32), E)[None, :]           # (1, CE)

    # word_flat folded to act per (channel, emb lane): wflat[(c,e), e'] = wf[c]*I[e,e'].
    wflat = (wf.astype(jnp.float32)[:, None, None]
             * jnp.eye(E, dtype=jnp.float32)[None, :, :]).reshape(CE, E)

    # Packed news-stage params -> one small resident VMEM tile.
    pk = jnp.zeros((UC + 2, H + 2), jnp.float32)
    pk = pk.at[0:UC, 0:H].set(wn.astype(jnp.float32))
    pk = pk.at[0:UC, H].set(bn.astype(jnp.float32))
    pk = pk.at[UC, 0:UC].set(wu.astype(jnp.float32))
    pk = pk.at[UC + 1, 0].set(bf.astype(jnp.float32))
    pk = pk.at[UC + 1, 1].set(bu.astype(jnp.float32))

    bt = _pick_batch_tile(B)
    kernel = _make_kernel(bt, H, C, TW, UC)

    out = pl.pallas_call(
        kernel,
        out_shape=jax.ShapeDtypeStruct((B, 1, C), jnp.float32),
        grid=(B // bt,),
        in_specs=[
            pl.BlockSpec((bt, NT, T), lambda b: (b, 0, 0)),     # offset word ids
            pl.BlockSpec((T, TW), lambda b: (0, 0)),            # lane-repeat matrix
            pl.BlockSpec((TW, CE), lambda b: (0, 0)),           # fused gather+conv wt
            pl.BlockSpec((1, CE), lambda b: (0, 0)),            # word-conv bias row
            pl.BlockSpec((CE, E), lambda b: (0, 0)),            # word_flat weight
            pl.BlockSpec((UC + 2, H + 2), lambda b: (0, 0)),    # packed news params
        ],
        out_specs=pl.BlockSpec((bt, 1, C), lambda b: (b, 0, 0)),
        compiler_params=pltpu.CompilerParams(
            dimension_semantics=("parallel",)),
    )(ids, rep, vgc, bcrow, wflat, pk)

    # (B, 1, C) -> (B, C); matches final_res.reshape(B, -1).softmax(1).squeeze()
    return out.reshape(B, C)


def reference_forward(clicked, candidates, params):
    """Pure-JAX reference mirroring the torch forward (no dropout)."""
    emb, wc, bc, wf, bf, wn, bn, wu, bu = params
    B, H, T = clicked.shape
    _, C, _ = candidates.shape
    E = emb.shape[1]
    hp = jax.lax.Precision.HIGHEST
    clk = jnp.take(emb, clicked, axis=0)      # (B,H,T,E)
    cnd = jnp.take(emb, candidates, axis=0)   # (B,C,T,E)

    def title_encode(x):  # (N, T, E) -> (N, E)
        conv = jnp.einsum('ct,nte->nce', wc, x, precision=hp) + bc[None, :, None]
        conv = jnp.maximum(conv, 0.0)
        return jnp.einsum('c,nce->ne', wf, conv, precision=hp) + bf

    tclk = title_encode(clk.reshape(B * H, T, E)).reshape(B, H, E)
    conv_u = jnp.einsum('ch,bhe->bce', wn, tclk, precision=hp) + bn[None, :, None]
    conv_u = jnp.maximum(conv_u, 0.0)
    user = jnp.einsum('c,bce->be', wu, conv_u, precision=hp) + bu        # (B, E)
    tcnd = title_encode(cnd.reshape(B * C, T, E)).reshape(B, C, E)
    scores = jnp.einsum('bce,be->bc', tcnd, user, precision=hp)
    return jax.nn.softmax(scores, axis=1)


def init_params(key, word_num=50, emb_size=32, wd_out_chn=8, us_out_chn=8):
    ks = jax.random.split(key, 9)
    emb = 0.1 * jax.random.normal(ks[0], (word_num, emb_size), jnp.float32)
    wc = 0.1 * jax.random.normal(ks[1], (wd_out_chn, WORD_KERNEL), jnp.float32)
    bc = 0.1 * jax.random.normal(ks[2], (wd_out_chn,), jnp.float32)
    wf = 0.1 * jax.random.normal(ks[3], (wd_out_chn,), jnp.float32)
    bf = 0.1 * jax.random.normal(ks[4], (), jnp.float32)
    wn = 0.1 * jax.random.normal(ks[5], (us_out_chn, NEWS_KERNEL), jnp.float32)
    bn = 0.1 * jax.random.normal(ks[6], (us_out_chn,), jnp.float32)
    wu = 0.1 * jax.random.normal(ks[7], (us_out_chn,), jnp.float32)
    bu = 0.1 * jax.random.normal(ks[8], (), jnp.float32)
    return (emb, wc, bc, wf, bf, wn, bn, wu, bu)


if __name__ == "__main__":
    key = jax.random.PRNGKey(0)
    k_params, k_clk, k_cnd = jax.random.split(key, 3)

    B, H, T, C, WORD_NUM = 2, NEWS_KERNEL, WORD_KERNEL, 4, 50
    params = init_params(k_params, word_num=WORD_NUM)

    clicked = jax.random.randint(k_clk, (B, H, T), 0, WORD_NUM, dtype=jnp.int32)
    candidates = jax.random.randint(k_cnd, (B, C, T), 0, WORD_NUM, dtype=jnp.int32)

    out = jax.block_until_ready(double_cnn_forward(clicked, candidates, params))
    ref = jax.block_until_ready(reference_forward(clicked, candidates, params))

    np.testing.assert_allclose(np.asarray(out), np.asarray(ref),
                               rtol=1e-5, atol=1e-5)
    assert out.shape == (B, C)
    print("KERNEL_OK")
</pallas_src>

<mosaic_0001>
module attributes {stable_mosaic.version = 11 : i64} {
  func.func @kernel(%arg0: i32, %arg1: memref<1x39x15xf32, #tpu.memory_space<vmem>>, %arg2: memref<15x750xf32, #tpu.memory_space<vmem>>, %arg3: memref<750x256xf32, #tpu.memory_space<vmem>>, %arg4: memref<1x256xf32, #tpu.memory_space<vmem>>, %arg5: memref<256x32xf32, #tpu.memory_space<vmem>>, %arg6: memref<10x37xf32, #tpu.memory_space<vmem>>, %arg7: memref<1x1x4xf32, #tpu.memory_space<vmem>>) attributes {dimension_semantics = [#tpu.dimension_semantics<parallel>], iteration_bounds = array<i64: 2>, scalar_prefetch = 0 : i64, scratch_operands = 0 : i64, tpu.core_type = #tpu.core_type<tc>, window_params = [{transform_indices = @transform_0, window_bounds = array<i64: 1, 39, 15>}, {pipeline_mode = #tpu.pipeline_mode<synchronous>, transform_indices = @transform_1, window_bounds = array<i64: 15, 750>}, {pipeline_mode = #tpu.pipeline_mode<synchronous>, transform_indices = @transform_2, window_bounds = array<i64: 750, 256>}, {pipeline_mode = #tpu.pipeline_mode<synchronous>, transform_indices = @transform_3, window_bounds = array<i64: 1, 256>}, {pipeline_mode = #tpu.pipeline_mode<synchronous>, transform_indices = @transform_4, window_bounds = array<i64: 256, 32>}, {pipeline_mode = #tpu.pipeline_mode<synchronous>, transform_indices = @transform_5, window_bounds = array<i64: 10, 37>}, {transform_indices = @transform_6, window_bounds = array<i64: 1, 1, 4>}]} {
    %c0 = arith.constant 0 : index
    %c0_0 = arith.constant 0 : index
    %0 = vector.load %arg2[%c0, %c0_0] : memref<15x750xf32, #tpu.memory_space<vmem>>, vector<15x750xf32>
    %c0_1 = arith.constant 0 : index
    %c0_2 = arith.constant 0 : index
    %1 = vector.load %arg3[%c0_1, %c0_2] : memref<750x256xf32, #tpu.memory_space<vmem>>, vector<750x256xf32>
    %c0_3 = arith.constant 0 : index
    %c0_4 = arith.constant 0 : index
    %2 = vector.load %arg4[%c0_3, %c0_4] : memref<1x256xf32, #tpu.memory_space<vmem>>, vector<1x256xf32>
    %c0_5 = arith.constant 0 : index
    %c0_6 = arith.constant 0 : index
    %3 = vector.load %arg5[%c0_5, %c0_6] : memref<256x32xf32, #tpu.memory_space<vmem>>, vector<256x32xf32>
    %c0_7 = arith.constant 0 : index
    %c0_8 = arith.constant 0 : index
    %4 = vector.load %arg6[%c0_7, %c0_8] : memref<10x37xf32, #tpu.memory_space<vmem>>, vector<10x37xf32>
    %5 = vector.extract_strided_slice %4 {offsets = [0, 0], sizes = [8, 35], strides = [1, 1]} : vector<10x37xf32> to vector<8x35xf32>
    %6 = vector.extract_strided_slice %4 {offsets = [0, 35], sizes = [8, 1], strides = [1, 1]} : vector<10x37xf32> to vector<8x1xf32>
    %7 = vector.extract_strided_slice %4 {offsets = [8, 0], sizes = [1, 8], strides = [1, 1]} : vector<10x37xf32> to vector<1x8xf32>
    %8 = vector.extract_strided_slice %4 {offsets = [9, 0], sizes = [1, 1], strides = [1, 1]} : vector<10x37xf32> to vector<1x1xf32>
    %9 = vector.extract_strided_slice %4 {offsets = [9, 1], sizes = [1, 1], strides = [1, 1]} : vector<10x37xf32> to vector<1x1xf32>
    %10 = tpu.iota {dimensions = array<i32: 1>} : vector<39x750xi32>
    %11 = arith.sitofp %10 : vector<39x750xi32> to vector<39x750xf32>
    %c0_9 = arith.constant 0 : index
    %c0_10 = arith.constant 0 : index
    %c0_11 = arith.constant 0 : index
    %12 = vector.load %arg1[%c0_9, %c0_10, %c0_11] : memref<1x39x15xf32, #tpu.memory_space<vmem>>, vector<1x39x15xf32>
    %13 = vector.shape_cast %12 : vector<1x39x15xf32> to vector<39x15xf32>
    %cst = arith.constant dense<0.000000e+00> : vector<39x750xf32>
    %14 = tpu.matmul %13, %0, %cst {dimension_numbers = #tpu.dot_dimension_numbers<[1], [0], [0], [1], [0, 0, 1, 1], [], []>} : vector<39x15xf32>, vector<15x750xf32>, vector<39x750xf32> -> vector<39x750xf32>
    %15 = arith.subf %14, %11 : vector<39x750xf32>
    %16 = math.absf %15 : vector<39x750xf32>
    %cst_12 = arith.constant 5.000000e-01 : f32
    %17 = vector.broadcast %cst_12 : f32 to vector<39x750xf32>
    %18 = arith.cmpf olt, %16, %17 : vector<39x750xf32>
    %19 = arith.extui %18 : vector<39x750xi1> to vector<39x750xi32>
    %20 = arith.sitofp %19 : vector<39x750xi32> to vector<39x750xf32>
    %cst_13 = arith.constant dense<0.000000e+00> : vector<39x256xf32>
    %21 = tpu.matmul %20, %1, %cst_13 {dimension_numbers = #tpu.dot_dimension_numbers<[1], [0], [0], [1], [0, 0, 1, 1], [], []>} : vector<39x750xf32>, vector<750x256xf32>, vector<39x256xf32> -> vector<39x256xf32>
    %22 = vector.broadcast %2 : vector<1x256xf32> to vector<39x256xf32>
    %23 = arith.addf %21, %22 : vector<39x256xf32>
    %cst_14 = arith.constant 0.000000e+00 : f32
    %24 = vector.broadcast %cst_14 : f32 to vector<39x256xf32>
    %25 = arith.maximumf %23, %24 : vector<39x256xf32>
    %cst_15 = arith.constant dense<0.000000e+00> : vector<39x32xf32>
    %26 = tpu.matmul %25, %3, %cst_15 {dimension_numbers = #tpu.dot_dimension_numbers<[1], [0], [0], [1], [0, 0, 1, 1], [], []>} : vector<39x256xf32>, vector<256x32xf32>, vector<39x32xf32> -> vector<39x32xf32>
    %27 = vector.broadcast %8 : vector<1x1xf32> to vector<39x32xf32>
    %28 = arith.addf %26, %27 : vector<39x32xf32>
    %29 = vector.extract_strided_slice %28 {offsets = [0, 0], sizes = [35, 32], strides = [1, 1]} : vector<39x32xf32> to vector<35x32xf32>
    %30 = vector.extract_strided_slice %28 {offsets = [35, 0], sizes = [4, 32], strides = [1, 1]} : vector<39x32xf32> to vector<4x32xf32>
    %cst_16 = arith.constant dense<0.000000e+00> : vector<8x32xf32>
    %31 = tpu.matmul %5, %29, %cst_16 {dimension_numbers = #tpu.dot_dimension_numbers<[1], [0], [0], [1], [0, 0, 1, 1], [], []>} : vector<8x35xf32>, vector<35x32xf32>, vector<8x32xf32> -> vector<8x32xf32>
    %32 = vector.broadcast %6 : vector<8x1xf32> to vector<8x32xf32>
    %33 = arith.addf %31, %32 : vector<8x32xf32>
    %cst_17 = arith.constant 0.000000e+00 : f32
    %34 = vector.broadcast %cst_17 : f32 to vector<8x32xf32>
    %35 = arith.maximumf %33, %34 : vector<8x32xf32>
    %cst_18 = arith.constant dense<0.000000e+00> : vector<1x32xf32>
    %36 = tpu.matmul %7, %35, %cst_18 {dimension_numbers = #tpu.dot_dimension_numbers<[1], [0], [0], [1], [0, 0, 1, 1], [], []>} : vector<1x8xf32>, vector<8x32xf32>, vector<1x32xf32> -> vector<1x32xf32>
    %37 = vector.broadcast %9 : vector<1x1xf32> to vector<1x32xf32>
    %38 = arith.addf %36, %37 : vector<1x32xf32>
    %cst_19 = arith.constant dense<0.000000e+00> : vector<1x4xf32>
    %39 = tpu.matmul %38, %30, %cst_19 {dimension_numbers = #tpu.dot_dimension_numbers<[1], [1], [0], [0], [0, 0, 1, 0], [], []>} : vector<1x32xf32>, vector<4x32xf32>, vector<1x4xf32> -> vector<1x4xf32>
    %cst_20 = arith.constant dense<0xFF800000> : vector<1xf32>
    %40 = vector.multi_reduction <maximumf>, %39, %cst_20 [1] : vector<1x4xf32> to vector<1xf32>
    %41 = vector.shape_cast %40 : vector<1xf32> to vector<1x1xf32>
    %42 = vector.broadcast %41 : vector<1x1xf32> to vector<1x4xf32>
    %43 = arith.subf %39, %42 : vector<1x4xf32>
    %44 = math.exp %43 : vector<1x4xf32>
    %cst_21 = arith.constant dense<0.000000e+00> : vector<1xf32>
    %45 = vector.multi_reduction <add>, %44, %cst_21 [1] : vector<1x4xf32> to vector<1xf32>
    %46 = vector.shape_cast %45 : vector<1xf32> to vector<1x1xf32>
    %47 = vector.broadcast %46 : vector<1x1xf32> to vector<1x4xf32>
    %48 = arith.divf %44, %47 : vector<1x4xf32>
    %c0_22 = arith.constant 0 : index
    %c0_23 = arith.constant 0 : index
    %c0_24 = arith.constant 0 : index
    %49 = vector.load %arg7[%c0_22, %c0_23, %c0_24] : memref<1x1x4xf32, #tpu.memory_space<vmem>>, vector<1x1x4xf32>
    %50 = vector.shape_cast %49 : vector<1x1x4xf32> to vector<1x4xf32>
    %51 = vector.shape_cast %48 : vector<1x4xf32> to vector<1x1x4xf32>
    tpu.vector_store %arg7[%c0_22, %c0_23, %c0_24], %51 {strides = array<i32>} : memref<1x1x4xf32, #tpu.memory_space<vmem>>, vector<1x1x4xf32>,
    return
  }
  func.func @transform_0(%arg0: i32) -> (i32, i32, i32) {
    %c0_i32 = arith.constant 0 : i32
    %c0_i32_0 = arith.constant 0 : i32
    %c0_i32_1 = arith.constant 0 : i32
    return %arg0, %c0_i32, %c0_i32_0 : i32, i32, i32
  }
  func.func @transform_1(%arg0: i32) -> (i32, i32) {
    %c0_i32 = arith.constant 0 : i32
    %c0_i32_0 = arith.constant 0 : i32
    %c0_i32_1 = arith.constant 0 : i32
    return %c0_i32, %c0_i32_0 : i32, i32
  }
  func.func @transform_2(%arg0: i32) -> (i32, i32) {
    %c0_i32 = arith.constant 0 : i32
    %c0_i32_0 = arith.constant 0 : i32
    %c0_i32_1 = arith.constant 0 : i32
    return %c0_i32, %c0_i32_0 : i32, i32
  }
  func.func @transform_3(%arg0: i32) -> (i32, i32) {
    %c0_i32 = arith.constant 0 : i32
    %c0_i32_0 = arith.constant 0 : i32
    %c0_i32_1 = arith.constant 0 : i32
    return %c0_i32, %c0_i32_0 : i32, i32
  }
  func.func @transform_4(%arg0: i32) -> (i32, i32) {
    %c0_i32 = arith.constant 0 : i32
    %c0_i32_0 = arith.constant 0 : i32
    %c0_i32_1 = arith.constant 0 : i32
    return %c0_i32, %c0_i32_0 : i32, i32
  }
  func.func @transform_5(%arg0: i32) -> (i32, i32) {
    %c0_i32 = arith.constant 0 : i32
    %c0_i32_0 = arith.constant 0 : i32
    %c0_i32_1 = arith.constant 0 : i32
    return %c0_i32, %c0_i32_0 : i32, i32
  }
  func.func @transform_6(%arg0: i32) -> (i32, i32, i32) {
    %c0_i32 = arith.constant 0 : i32
    %c0_i32_0 = arith.constant 0 : i32
    %c0_i32_1 = arith.constant 0 : i32
    return %arg0, %c0_i32, %c0_i32_0 : i32, i32, i32
  }
}

</mosaic_0001>

<bundles_post_ra>
// kernel: double_cnn_forward.1
= control target key start
LH: loop header
LB: loop body
LE: loop exit
PB: predicated region body
PF: predicated region fallthrough
CT: control target
= control target key end

     0   :  { %11 = vsyncpa [#allocation3], 0  ;;  %s3029_s0 = inlined_call_operand.vmem [shape: f32[2,39,15], index: 0, kind: input, shape index: {}]   ;;  %s3030_s1 = inlined_call_operand.vmem [shape: f32[15,750], index: 1, kind: input, shape index: {}]   ;;  %s3031_s2 = inlined_call_operand.vmem [shape: f32[750,256], index: 2, kind: input, shape index: {}]   ;;  %s3032_s3 = inlined_call_operand.vmem [shape: f32[1,256], index: 3, kind: input, shape index: {}]   ;;  %s3033_s4 = inlined_call_operand.vmem [shape: f32[256,32], index: 4, kind: input, shape index: {}]   ;;  %s3034_s5 = inlined_call_operand.vmem [shape: f32[10,37], index: 5, kind: input, shape index: {}]   ;;  %s3035_s6 = inlined_call_operand.hbm [shape: f32[2,1,4], index: 6, kind: output, shape index: {}]  }
   0x1   :  { %13 = vsyncpa [#allocation3 + $0x1], 0  ;;  %s2047_s21 = smov 0   ;;  %s2049_s22 = smov 0  }
   0x2   :  { %s2051_s23 = smov 0   ;;  %s2053_s24 = smov 0  }
   0x3 LB: > { %s2068_s25 = sadd.s32 4294967295, %s2004_s24   ;;  %s1715_s26 = sadd.s32 4294967294, %s2004_s24   ;;  %s2004_s24 = sphi %s2053_s24, %s3041_s24   ;;  %s2000_s23 = sphi %s2051_s23, %s3040_s23   ;;  %s1996_s22 = sphi %s2049_s22, %s3039_s22   ;;  %s1992_s21 = sphi %s2047_s21, %s3038_s21  }
   0x4   : > { %s2072_s27 = sadd.s32 1, %s2004_s24   ;;  %s157_s28 = sadd.s32 1, %s2000_s23 }
   0x5   : > { %s154_s29 = ssub.s32 %s2004_s24, %s2072_s27  ;;  %p167_p0 = scmp.ne.s32.totalorder %s2000_s23, %s1996_s22 }
   0x6   : > { %p155_p1 = scmp.eq.s32.totalorder %s154_s29, 0  ;;  %p168_p2 = scmp.eq.s32.totalorder %s2068_s25, 1 }
   0x7   : > { %p173_p3 = scmp.ne.s32.totalorder %s1996_s22, %s1992_s21  ;;  %p174_p4 = scmp.eq.s32.totalorder %s1715_s26, 1 }
   0x8   : > { %s2083_s30 = scalar_select %p155_p1, %s2000_s23, %s157_s28  }
   0x9   : > { %p2085_p5 = por %p168_p2, %p167_p0  ;;  %p2089_p6 = por %p174_p4, %p173_p3 }
   0xa   : > { %p1718_p7 = scmp.ge.s32.totalorder %s2004_s24, 1  ;;  %p215_p8 = scmp.lt.s32.totalorder %s2004_s24, 3 }
   0xc   : > { %p216_p9 = pnand %p1718_p7, %p215_p8 }
   0xd   : > { %p244_p10 = scmp.lt.s32.totalorder (!%p216_p9), %s2068_s25, 1  ;;  %s242_s26 = sand.u32 (!%p216_p9), 1, %s1996_s22  }
   0xe   : > { %219 = sbr.rel (%p216_p9) target bundleno = 1622 (0x656), region = 44  ;;  %s1808_s28 = sshll.u32 (!%p216_p9), %s2068_s25, 4 }
   0xf   : > { %s243_s29 = scalar_lea.vmem (!%p216_p9), [#allocation2], %s242_s26  ;;  %s1648_s13 = scalar_lea.sflag (!%p216_p9), [#allocation3], %s242_s26 }
  0x10   : > { %s1660_s9 = sshll.u32 (!%p216_p9), %s243_s29, 4  ;;  %s1661_s9 = int_to_ptr.vmem [resolvable:$true] %s1660_s9 }
  0x11   : > { %s1944_s14 = scalar_lea.vmem (!%p216_p9), %s1661_s9, 16 }
  0x12   : > { %p1945_p11 = scmp.ne.s32.totalorder (!%p216_p9), %s1661_s9, %s1944_s14 }
  0x13   : > { %v256_v0 = vld [vmem:[%s3030_s1 + $0x38] sm:$0x7f]  ;;  %vm518_vm0 = vcmask 1046528   ;;  %v255_v1 = vld [vmem:[%s3030_s1 + $0x30] sm:$0x7f]  ;;  %v250_v2 = vld [vmem:[%s3030_s1 + $0x8] sm:$0xff] }
  0x14   : > { %1720 = vmatprep.subr.msk.mxu0 %vm518_vm0, %v256_v0  ;;  %v258_v3 = vld [vmem:[%s3030_s1 + $0x48] sm:$0x7f]  ;;  %v249_v4 = vld [vmem:[%s3030_s1] sm:$0xff]  ;;  %v252_v6 = vld [vmem:[%s3030_s1 + $0x18] sm:$0xff]  ;;  %v2006_v7 = vmov 0.0   ;;  %s245_s12 = scalar_select %p244_p10, %s2068_s25, 1 }
  0x15   : > { %v257_v5 = vld [vmem:[%s3030_s1 + $0x40] sm:$0x7f]  ;;  %1721 = vmatpush1.msk.msra.mxu0 %vm518_vm0, %v255_v1  ;;  %1727 = vmatprep.subr.msk.mxu1 %vm518_vm0, %v258_v3  ;;  %v251_v8 = vld [vmem:[%s3030_s1 + $0x10] sm:$0xff]  ;;  %v260_v9 = vld [vmem:[%s3030_s1 + $0x58] sm:$0x7f]  ;;  %vm502_vm1 = vcmask 121856   ;;  %p1946_p12 = pnand %p1945_p11, %p2085_p5 }
  0x16   : > { %567 = vmatprep.subr.mxu0 %v250_v2  ;;  %601 = vmatprep.mubr.f32.mxu0 %v2006_v7  ;;  %v292_v10 = vld [vmem:[%s3031_s2 + $0xf8] sm:$0xff]  ;;  %s1891_s15 = smul.u32 40, %s245_s12  ;;  %v259_v12 = vld [vmem:[%s3030_s1 + $0x50] sm:$0x7f]  ;;  %v254_v14 = vld [vmem:[%s3030_s1 + $0x28] sm:$0xff]  ;;  %s1658_s12 = scalar_lea.hbm %s3035_s6, %s1808_s28 }
  0x17   : > { %568 = vmatpush1.msra.mxu0 %v249_v4  ;;  %1728 = vmatpush1.msk.msra.mxu1 %vm518_vm0, %v257_v5  ;;  %v291_v13 = vld [vmem:[%s3031_s2 + $0xf0] sm:$0xff]  ;;  %v290_v15 = vld [vmem:[%s3031_s2 + $0xe8] sm:$0xff]  ;;  %v253_v17 = vld [vmem:[%s3030_s1 + $0x20] sm:$0xff]  ;;  %p1947_p13 = pneg %p1946_p12 }
  0x18   : > { %662 = vmatprep.subr.mxu1 %v252_v6  ;;  %696 = vmatprep.mubr.f32.mxu1 %v2006_v7  ;;  %s2137_s18 = scalar_lea.vmem %s3029_s0, %s1891_s15  ;;  %v289_v18 = vld [vmem:[%s3031_s2 + $0xe0] sm:$0xff]  ;;  %v356_v19 = vld [vmem:[%s3031_s2 + $0x2f8] sm:$0xff]  ;;  %v287_v22 = vld [vmem:[%s3031_s2 + $0xd0] sm:$0xff]  ;;  %s2011_s15 = smov [#allocation2]  }
  0x19   : > { %663 = vmatpush1.msra.mxu1 %v251_v8  ;;  %1734 = vmatprep.subr.msk.mxu0 %vm518_vm0, %v260_v9  ;;  %v497_v11 = vld [vmem:[%s2137_s18] sm:$0xff]  ;;  %v2156_v16 = vld [vmem:[%s2137_s18 + $0x8] sm:$0xff]  ;;  %v288_v20 = vld [vmem:[%s3031_s2 + $0xd8] sm:$0xff]  ;;  %s1948_s16 = sshll.u32 %s2011_s15, 4  ;;  %s1949_s16 = int_to_ptr.vmem [resolvable:$false] %s1948_s16 }
  0x1a   : > { %1006 = vmatprep.subr.mxu1 %v292_v10  ;;  %1722 = vmatmul.mubr.msk.f32.vlgmr.msra.gmra.mxu0 %vm502_vm1, %v497_v11  ;;  %v2178_v21 = vld [vmem:[%s2137_s18 + $0x10] sm:$0xff]  ;;  %v286_v23 = vld [vmem:[%s3031_s2 + $0xc8] sm:$0xff]  ;;  %v2193_v24 = vld [vmem:[%s2137_s18 + $0x18] sm:$0xff]  ;;  %s1950_s25 = scalar_lea.vmem %s1949_s16, 32  ;;  %p1951_p0 = scmp.lt.s32.totalorder %s1661_s9, %s1949_s16 }
  0x1b   : > { %1729 = vmatmul.mubr.msk.f32.vlgmr.msra.gmra.mxu1 %vm502_vm1, %v497_v11  ;;  %607 = vmatprep.mubr.f32.mxu0 %v2006_v7  ;;  %v285_v25 = vld [vmem:[%s3031_s2 + $0xc0] sm:$0xff]  ;;  %v284_v26 = vld [vmem:[%s3031_s2 + $0xb8] sm:$0xff]  ;;  %v283_v28 = vld [vmem:[%s3031_s2 + $0xb0] sm:$0xff]  ;;  %p1952_p1 = scmp.lt.s32.totalorder %s1950_s25, %s1944_s14 }
  0x1c   : > { %702 = vmatprep.mubr.f32.mxu1 %v2006_v7  ;;  %1735 = vmatpush1.msk.msra.mxu0 %vm518_vm0, %v259_v12  ;;  %v2208_v27 = vld [vmem:[%s2137_s18 + $0x20] sm:$0x7f]  ;;  %v282_v29 = vld [vmem:[%s3031_s2 + $0xa8] sm:$0xff]  ;;  %v280_v31 = vld [vmem:[%s3031_s2 + $0x98] sm:$0xff] }
  0x1d   : > { %1007 = vmatpush1.msra.mxu1 %v291_v13  ;;  %757 = vmatprep.subr.mxu0 %v254_v14  ;;  %v281_v30 = vld [vmem:[%s3031_s2 + $0xa0] sm:$0xff]  ;;  %v355_v32 = vld [vmem:[%s3031_s2 + $0x2f0] sm:$0xff]  ;;  %v354_v33 = vld [vmem:[%s3031_s2 + $0x2e8] sm:$0xff]  ;;  %p1953_p2 = por %p1952_p1, %p1951_p0 }
  0x1e   : > { %1008 = vmatprep.subr.mxu1 %v290_v15  ;;  %1723 = vmatmul.mubr.msk.f32.gmra.mxu0 %vm502_vm1, %v2156_v16  ;;  %v279_v34 = vld [vmem:[%s3031_s2 + $0x90] sm:$0xff]  ;;  %v353_v35 = vld [vmem:[%s3031_s2 + $0x2e0] sm:$0xff]  ;;  %v278_v36 = vld [vmem:[%s3031_s2 + $0x88] sm:$0xff] }
  0x1f   : > { %1730 = vmatmul.mubr.msk.f32.gmra.mxu1 %vm502_vm1, %v2156_v16  ;;  %613 = vmatprep.mubr.f32.mxu0 %v2006_v7  ;;  %v352_v37 = vld [vmem:[%s3031_s2 + $0x2d8] sm:$0xff]  ;;  %v351_v38 = vld [vmem:[%s3031_s2 + $0x2d0] sm:$0xff]  ;;  %v350_v39 = vld [vmem:[%s3031_s2 + $0x2c8] sm:$0xff]  ;;  %p1954_p3 = pnand %p1953_p2, %p1947_p13 }
  0x20   : > { %708 = vmatprep.mubr.f32.mxu1 %v2006_v7  ;;  %758 = vmatpush1.msra.mxu0 %v253_v17  ;;  %v277_v40 = vld [vmem:[%s3031_s2 + $0x80] sm:$0xff]  ;;  %v276_v42 = vld [vmem:[%s3031_s2 + $0x78] sm:$0xff]  ;;  %v347_v44 = vld [vmem:[%s3031_s2 + $0x2b0] sm:$0xff] }
  0x21   : > { %1009 = vmatpush1.msra.mxu1 %v289_v18  ;;  %1101 = vmatprep.subr.mxu0 %v356_v19  ;;  %v349_v41 = vld [vmem:[%s3031_s2 + $0x2c0] sm:$0xff]  ;;  %v348_v43 = vld [vmem:[%s3031_s2 + $0x2b8] sm:$0xff]  ;;  %v346_v45 = vld [vmem:[%s3031_s2 + $0x2a8] sm:$0xff] }
  0x22   : > { %1010 = vmatprep.subr.mxu1 %v288_v20  ;;  %1724 = vmatmul.mubr.msk.f32.gmra.mxu0 %vm502_vm1, %v2178_v21  ;;  %v275_v46 = vld [vmem:[%s3031_s2 + $0x70] sm:$0xff]  ;;  %v345_v47 = vld [vmem:[%s3031_s2 + $0x2a0] sm:$0xff]  ;;  %v274_v48 = vld [vmem:[%s3031_s2 + $0x68] sm:$0xff] }
  0x23   : > { %1731 = vmatmul.mubr.msk.f32.gmra.mxu1 %vm502_vm1, %v2178_v21  ;;  %619 = vmatprep.mubr.f32.mxu0 %v2006_v7  ;;  %v344_v49 = vld [vmem:[%s3031_s2 + $0x298] sm:$0xff]  ;;  %v343_v50 = vld [vmem:[%s3031_s2 + $0x290] sm:$0xff]  ;;  %v342_v51 = vld [vmem:[%s3031_s2 + $0x288] sm:$0xff] }
  0x24   : > { %714 = vmatprep.mubr.f32.mxu1 %v2006_v7  ;;  %1011 = vmatpush1.msra.mxu1 %v287_v22  ;;  %v273_v52 = vld [vmem:[%s3031_s2 + $0x60] sm:$0xff]  ;;  %v272_v54 = vld [vmem:[%s3031_s2 + $0x58] sm:$0xff]  ;;  %v339_v56 = vld [vmem:[%s3031_s2 + $0x270] sm:$0xff] }
  0x25   : > { %1012 = vmatprep.subr.mxu1 %v286_v23  ;;  %v341_v53 = vld [vmem:[%s3031_s2 + $0x280] sm:$0xff]  ;;  %v340_v55 = vld [vmem:[%s3031_s2 + $0x278] sm:$0xff]  ;;  %v271_v57 = vld [vmem:[%s3031_s2 + $0x50] sm:$0xff] }
  0x26   : > { %1725 = vmatmul.mubr.msk.f32.gmra.mxu0 %vm502_vm1, %v2193_v24  ;;  %1013 = vmatpush1.msra.mxu1 %v285_v25  ;;  %v338_v58 = vld [vmem:[%s3031_s2 + $0x268] sm:$0xff]  ;;  %v337_v60 = vld [vmem:[%s3031_s2 + $0x260] sm:$0xff]  ;;  %v336_v62 = vld [vmem:[%s3031_s2 + $0x258] sm:$0xff] }
  0x27   : > { %1732 = vmatmul.mubr.msk.f32.gmra.mxu1 %vm502_vm1, %v2193_v24  ;;  %625 = vmatprep.mubr.f32.mxu0 %v2006_v7  ;;  %v270_v59 = vld [vmem:[%s3031_s2 + $0x48] sm:$0xff]  ;;  %v269_v61 = vld [vmem:[%s3031_s2 + $0x40] sm:$0xff]  ;;  %v268_v63 = vld [vmem:[%s3031_s2 + $0x38] sm:$0xff] }
  0x28   : > { %720 = vmatprep.mubr.f32.mxu1 %v2006_v7  ;;  %1014 = vmatprep.subr.mxu1 %v284_v26  ;;  %v335_v0 = vld [vmem:[%s3031_s2 + $0x250] sm:$0xff]  ;;  %v334_v2 = vld [vmem:[%s3031_s2 + $0x248] sm:$0xff]  ;;  %v333_v4 = vld [vmem:[%s3031_s2 + $0x240] sm:$0xff] }
  0x29   : > { %1015 = vmatpush1.msra.mxu1 %v283_v28  ;;  %v267_v1 = vld [vmem:[%s3031_s2 + $0x30] sm:$0xff]  ;;  %v266_v3 = vld [vmem:[%s3031_s2 + $0x28] sm:$0xff]  ;;  %v265_v5 = vld [vmem:[%s3031_s2 + $0x20] sm:$0xff] }
  0x2a   : > { %1726 = vmatmul.mubr.msk.f32.gmra.mxu0 %vm502_vm1, %v2208_v27  ;;  %1016 = vmatprep.subr.mxu1 %v282_v29  ;;  %v332_v6 = vld [vmem:[%s3031_s2 + $0x238] sm:$0xff]  ;;  %v331_v9 = vld [vmem:[%s3031_s2 + $0x230] sm:$0xff]  ;;  %v262_v12 = vld [vmem:[%s3031_s2 + $0x8] sm:$0xff] }
  0x2b   : > { %1733 = vmatmul.mubr.msk.f32.gmra.mxu1 %vm502_vm1, %v2208_v27  ;;  %791 = vmatprep.mubr.f32.mxu0 %v2006_v7  ;;  %v264_v8 = vld [vmem:[%s3031_s2 + $0x18] sm:$0xff]  ;;  %v263_v10 = vld [vmem:[%s3031_s2 + $0x10] sm:$0xff]  ;;  %v329_v13 = vld [vmem:[%s3031_s2 + $0x220] sm:$0xff] }
  0x2c   : > { %1017 = vmatpush1.msra.mxu1 %v281_v30  ;;  %v261_v14 = vld [vmem:[%s3031_s2] sm:$0xff]  ;;  %v328_v15 = vld [vmem:[%s3031_s2 + $0x218] sm:$0xff]  ;;  %v327_v17 = vld [vmem:[%s3031_s2 + $0x210] sm:$0xff] }
  0x2d   : > { %1018 = vmatprep.subr.mxu1 %v280_v31  ;;  %v323_v18 = vld [vmem:[%s3031_s2 + $0x1f0] sm:$0xff]  ;;  %v326_v19 = vld [vmem:[%s3031_s2 + $0x208] sm:$0xff]  ;;  %v321_v22 = vld [vmem:[%s3031_s2 + $0x1e0] sm:$0xff] }
  0x2e   : > { %1736 = vmatmul.mubr.msk.f32.vlgmr.msra.gmra.mxu0 %vm502_vm1, %v497_v11  ;;  %1019 = vmatpush1.msra.mxu1 %v279_v34  ;;  %v330_v11 = vld [vmem:[%s3031_s2 + $0x228] sm:$0xff]  ;;  %v388_v23 = vld [vmem:[%s3031_s2 + $0x3f8] sm:$0xff]  ;;  %v387_v25 = vld [vmem:[%s3031_s2 + $0x3f0] sm:$0xff] }
  0x2f   : > { %797 = vmatprep.mubr.f32.mxu0 %v2006_v7  ;;  %1102 = vmatpush1.msra.mxu0 %v355_v32  ;;  %v322_v20 = vld [vmem:[%s3031_s2 + $0x1e8] sm:$0xff]  ;;  %v319_v26 = vld [vmem:[%s3031_s2 + $0x1d0] sm:$0xff]  ;;  %v385_v29 = vld [vmem:[%s3031_s2 + $0x3e0] sm:$0xff] }
  0x30   : > { %1103 = vmatprep.subr.mxu0 %v354_v33  ;;  %1020 = vmatprep.subr.mxu1 %v278_v36  ;;  %v318_v28 = vld [vmem:[%s3031_s2 + $0x1c8] sm:$0xff]  ;;  %v317_v30 = vld [vmem:[%s3031_s2 + $0x1c0] sm:$0xff]  ;;  %v384_v31 = vld [vmem:[%s3031_s2 + $0x3d8] sm:$0xff] }
  0x31   : > { %1104 = vmatpush1.msra.mxu0 %v353_v35  ;;  %1021 = vmatpush1.msra.mxu1 %v277_v40  ;;  %v316_v32 = vld [vmem:[%s3031_s2 + $0x1b8] sm:$0xff]  ;;  %v383_v33 = vld [vmem:[%s3031_s2 + $0x3d0] sm:$0xff]  ;;  %v382_v35 = vld [vmem:[%s3031_s2 + $0x3c8] sm:$0xff] }
  0x32   : > { %1737 = vmatmul.mubr.msk.f32.gmra.mxu0 %vm502_vm1, %v2156_v16  ;;  %1105 = vmatprep.subr.mxu0 %v352_v37  ;;  %v324_v16 = vld [vmem:[%s3031_s2 + $0x1f8] sm:$0xff]  ;;  %v315_v34 = vld [vmem:[%s3031_s2 + $0x1b0] sm:$0xff]  ;;  %v314_v36 = vld [vmem:[%s3031_s2 + $0x1a8] sm:$0xff] }
  0x33   : > { %803 = vmatprep.mubr.f32.mxu0 %v2006_v7  ;;  %1106 = vmatpush1.msra.mxu0 %v351_v38  ;;  %v381_v37 = vld [vmem:[%s3031_s2 + $0x3c0] sm:$0xff]  ;;  %v312_v40 = vld [vmem:[%s3031_s2 + $0x198] sm:$0xff] }
  0x34   : > { %1107 = vmatprep.subr.mxu0 %v350_v39  ;;  %1022 = vmatprep.subr.mxu1 %v276_v42  ;;  %v313_v38 = vld [vmem:[%s3031_s2 + $0x1a0] sm:$0xff]  ;;  %v380_v39 = vld [vmem:[%s3031_s2 + $0x3b8] sm:$0xff]  ;;  %v311_v42 = vld [vmem:[%s3031_s2 + $0x190] sm:$0xff] }
  0x35   : > { %1108 = vmatpush1.msra.mxu0 %v349_v41  ;;  %1023 = vmatpush1.msra.mxu1 %v275_v46  ;;  %v379_v41 = vld [vmem:[%s3031_s2 + $0x3b0] sm:$0xff]  ;;  %v309_v46 = vld [vmem:[%s3031_s2 + $0x180] sm:$0xff] }
  0x36   : > { %1738 = vmatmul.mubr.msk.f32.gmra.mxu0 %vm502_vm1, %v2178_v21  ;;  %1109 = vmatprep.subr.mxu0 %v348_v43  ;;  %v325_v21 = vld [vmem:[%s3031_s2 + $0x200] sm:$0xff]  ;;  %v378_v43 = vld [vmem:[%s3031_s2 + $0x3a8] sm:$0xff] }
  0x37   : > { %809 = vmatprep.mubr.f32.mxu0 %v2006_v7  ;;  %1110 = vmatpush1.msra.mxu0 %v347_v44  ;;  %v310_v44 = vld [vmem:[%s3031_s2 + $0x188] sm:$0xff] }
  0x38   : > { %1111 = vmatprep.subr.mxu0 %v346_v45  ;;  %1024 = vmatprep.subr.mxu1 %v274_v48  ;;  %v377_v45 = vld [vmem:[%s3031_s2 + $0x3a0] sm:$0xff]  ;;  %v308_v48 = vld [vmem:[%s3031_s2 + $0x178] sm:$0xff] }
  0x39   : > { %1112 = vmatpush1.msra.mxu0 %v345_v47  ;;  %1025 = vmatpush1.msra.mxu1 %v273_v52  ;;  %v376_v47 = vld [vmem:[%s3031_s2 + $0x398] sm:$0xff]  ;;  %v306_v52 = vld [vmem:[%s3031_s2 + $0x168] sm:$0xff] }
  0x3a   : > { %1739 = vmatmul.mubr.msk.f32.gmra.mxu0 %vm502_vm1, %v2193_v24  ;;  %1113 = vmatprep.subr.mxu0 %v344_v49  ;;  %v320_v24 = vld [vmem:[%s3031_s2 + $0x1d8] sm:$0xff]  ;;  %v375_v49 = vld [vmem:[%s3031_s2 + $0x390] sm:$0xff] }
  0x3b   : > { %815 = vmatprep.mubr.f32.mxu0 %v2006_v7  ;;  %1114 = vmatpush1.msra.mxu0 %v343_v50  ;;  %v307_v50 = vld [vmem:[%s3031_s2 + $0x170] sm:$0xff] }
  0x3c   : > { %1115 = vmatprep.subr.mxu0 %v342_v51  ;;  %1026 = vmatprep.subr.mxu1 %v272_v54  ;;  %v374_v51 = vld [vmem:[%s3031_s2 + $0x388] sm:$0xff]  ;;  %v305_v54 = vld [vmem:[%s3031_s2 + $0x160] sm:$0xff] }
  0x3d   : > { %1116 = vmatpush1.msra.mxu0 %v341_v53  ;;  %1027 = vmatpush1.msra.mxu1 %v271_v57  ;;  %v373_v53 = vld [vmem:[%s3031_s2 + $0x380] sm:$0xff]  ;;  %v371_v57 = vld [vmem:[%s3031_s2 + $0x370] sm:$0xff] }
  0x3e   : > { %1740 = vmatmul.mubr.msk.f32.gmra.mxu0 %vm502_vm1, %v2208_v27  ;;  %1117 = vmatprep.subr.mxu0 %v340_v55  ;;  %v386_v27 = vld [vmem:[%s3031_s2 + $0x3e8] sm:$0xff]  ;;  %v372_v55 = vld [vmem:[%s3031_s2 + $0x378] sm:$0xff] }
  0x3f   : > { %1118 = vmatpush1.msra.mxu0 %v339_v56  ;;  %1028 = vmatprep.subr.mxu1 %v270_v59  ;;  %v304_v56 = vld [vmem:[%s3031_s2 + $0x158] sm:$0xff]  ;;  %v370_v59 = vld [vmem:[%s3031_s2 + $0x368] sm:$0xff] }
  0x40   : > { %1119 = vmatprep.subr.mxu0 %v338_v58  ;;  %1029 = vmatpush1.msra.mxu1 %v269_v61  ;;  %v303_v58 = vld [vmem:[%s3031_s2 + $0x150] sm:$0xff]  ;;  %v369_v61 = vld [vmem:[%s3031_s2 + $0x360] sm:$0xff] }
  0x41   : > { %1120 = vmatpush1.msra.mxu0 %v337_v60  ;;  %1030 = vmatprep.subr.mxu1 %v268_v63  ;;  %v302_v60 = vld [vmem:[%s3031_s2 + $0x148] sm:$0xff]  ;;  %v368_v63 = vld [vmem:[%s3031_s2 + $0x358] sm:$0xff] }
  0x42   : > { %1121 = vmatprep.subr.mxu0 %v336_v62  ;;  %1031 = vmatpush1.msra.mxu1 %v267_v1  ;;  %v301_v62 = vld [vmem:[%s3031_s2 + $0x140] sm:$0xff]  ;;  %v367_v1 = vld [vmem:[%s3031_s2 + $0x350] sm:$0xff] }
  0x43   : > { %1122 = vmatpush1.msra.mxu0 %v335_v0  ;;  %1032 = vmatprep.subr.mxu1 %v266_v3  ;;  %v300_v0 = vld [vmem:[%s3031_s2 + $0x138] sm:$0xff]  ;;  %v366_v3 = vld [vmem:[%s3031_s2 + $0x348] sm:$0xff] }
  0x44   : > { %1123 = vmatprep.subr.mxu0 %v334_v2  ;;  %1033 = vmatpush1.msra.mxu1 %v265_v5  ;;  %v299_v2 = vld [vmem:[%s3031_s2 + $0x130] sm:$0xff]  ;;  %v365_v5 = vld [vmem:[%s3031_s2 + $0x340] sm:$0xff] }
  0x45   : > { %1124 = vmatpush1.msra.mxu0 %v333_v4  ;;  %1034 = vmatprep.subr.mxu1 %v264_v8  ;;  %v298_v4 = vld [vmem:[%s3031_s2 + $0x128] sm:$0xff]  ;;  %v364_v8 = vld [vmem:[%s3031_s2 + $0x338] sm:$0xff] }
  0x46   : > { %1125 = vmatprep.subr.mxu0 %v332_v6  ;;  %1035 = vmatpush1.msra.mxu1 %v263_v10  ;;  %v297_v6 = vld [vmem:[%s3031_s2 + $0x120] sm:$0xff]  ;;  %v363_v10 = vld [vmem:[%s3031_s2 + $0x330] sm:$0xff] }
  0x47   : > { %1126 = vmatpush1.msra.mxu0 %v331_v9  ;;  %1036 = vmatprep.subr.mxu1 %v262_v12  ;;  %v296_v9 = vld [vmem:[%s3031_s2 + $0x118] sm:$0xff]  ;;  %v362_v12 = vld [vmem:[%s3031_s2 + $0x328] sm:$0xff] }
  0x48   : > { %1127 = vmatprep.subr.mxu0 %v330_v11  ;;  %1037 = vmatpush1.msra.mxu1 %v261_v14  ;;  %v295_v11 = vld [vmem:[%s3031_s2 + $0x110] sm:$0xff]  ;;  %v361_v14 = vld [vmem:[%s3031_s2 + $0x320] sm:$0xff] }
  0x49   : > { %1128 = vmatpush1.msra.mxu0 %v329_v13  ;;  %1038 = vmatprep.subr.mxu1 %v324_v16  ;;  %v294_v13 = vld [vmem:[%s3031_s2 + $0x108] sm:$0xff]  ;;  %v360_v16 = vld [vmem:[%s3031_s2 + $0x318] sm:$0xff] }
  0x4a   : > { %1129 = vmatprep.subr.mxu0 %v328_v15  ;;  %1039 = vmatpush2.msra.mxu1 %v323_v18  ;;  %v293_v15 = vld [vmem:[%s3031_s2 + $0x100] sm:$0xff]  ;;  %v359_v18 = vld [vmem:[%s3031_s2 + $0x310] sm:$0xff] }
  0x4b   : > { %1130 = vmatpush1.msra.mxu0 %v327_v17  ;;  %1040 = vmatprep.subr.mxu1 %v322_v20  ;;  %v420_v17 = vld [vmem:[%s3031_s2 + $0x4f8] sm:$0xff]  ;;  %v357_v20 = vld [vmem:[%s3031_s2 + $0x300] sm:$0xff] }
  0x4c   : > { %1131 = vmatprep.subr.mxu0 %v326_v19  ;;  %1041 = vmatpush2.msra.mxu1 %v321_v22  ;;  %v358_v19 = vld [vmem:[%s3031_s2 + $0x308] sm:$0xff] }
  0x4d   : > { %1132 = vmatpush1.msra.mxu0 %v325_v21  ;;  %1042 = vmatprep.subr.mxu1 %v320_v24  ;;  %v484_v21 = vlaneseq }
  0x4e   : > { %1133 = vmatprep.subr.mxu0 %v388_v23  ;;  %1043 = vmatpush2.msra.mxu1 %v319_v26 }
  0x4f   : > { %1134 = vmatpush2.msra.mxu0 %v387_v25  ;;  %1044 = vmatprep.subr.mxu1 %v318_v28  ;;  %v2587_v22 = vand.u32 127, %v484_v21 }
  0x50   : > { %1135 = vmatprep.subr.mxu0 %v386_v27  ;;  %1045 = vmatpush2.msra.mxu1 %v317_v30 }
  0x51   : > { %1136 = vmatpush2.msra.mxu0 %v385_v29  ;;  %1046 = vmatprep.subr.mxu1 %v316_v32  ;;  %v487_v23 = vadd.s32 256, %v2587_v22  ;;  %v486_v24 = vadd.s32 128, %v2587_v22  ;;  %v488_v25 = vadd.s32 384, %v2587_v22  ;;  %v2593_v26 = vcvt.s32.f32 %v2587_v22 }
  0x52   : > { %1137 = vmatprep.subr.mxu0 %v384_v31  ;;  %1047 = vmatpush2.msra.mxu1 %v315_v34 }
  0x53   : > { %1138 = vmatpush2.msra.mxu0 %v383_v33  ;;  %1048 = vmatprep.subr.mxu1 %v314_v36  ;;  %v2595_v27 = vcvt.s32.f32 %v487_v23  ;;  %v2597_v28 = vcvt.s32.f32 %v486_v24  ;;  %v2599_v29 = vcvt.s32.f32 %v488_v25  ;;  %v410_v24 = vld [vmem:[%s3031_s2 + $0x4a8] sm:$0xff] }
  0x54   : > { %1139 = vmatprep.subr.mxu0 %v382_v35  ;;  %1049 = vmatpush2.msra.mxu1 %v313_v38 }
  0x55   : > { %1140 = vmatpush2.msra.mxu0 %v381_v37  ;;  %1050 = vmatprep.subr.mxu1 %v312_v40 }
  0x56   : > { %1141 = vmatprep.subr.mxu0 %v380_v39  ;;  %1051 = vmatpush2.msra.mxu1 %v311_v42 }
  0x57   : > { %1142 = vmatpush2.msra.mxu0 %v379_v41  ;;  %1052 = vmatprep.subr.mxu1 %v310_v44 }
  0x58   : > { %1143 = vmatprep.subr.mxu0 %v378_v43  ;;  %1053 = vmatpush2.msra.mxu1 %v309_v46 }
  0x59   : > { %1144 = vmatpush2.msra.mxu0 %v377_v45  ;;  %1054 = vmatprep.subr.mxu1 %v308_v48  ;;  %v419_v48 = vld [vmem:[%s3031_s2 + $0x4f0] sm:$0xff] }
  0x5a   : > { %1145 = vmatprep.subr.mxu0 %v376_v47  ;;  %1055 = vmatpush2.msra.mxu1 %v307_v50 }
  0x5b   : > { %1146 = vmatpush2.msra.mxu0 %v375_v49  ;;  %1056 = vmatprep.subr.mxu1 %v306_v52  ;;  %v418_v52 = vld [vmem:[%s3031_s2 + $0x4e8] sm:$0xff] }
  0x5c   : > { %1147 = vmatprep.subr.mxu0 %v374_v51  ;;  %1057 = vmatpush2.msra.mxu1 %v305_v54  ;;  %v2007_v51 = vmov 1.0  }
  0x5d   : > { %1148 = vmatpush2.msra.mxu0 %v373_v53  ;;  %1058 = vmatprep.subr.mxu1 %v304_v56 }
  0x5e   : > { %1149 = vmatprep.subr.mxu0 %v372_v55  ;;  %1059 = vmatpush2.msra.mxu1 %v303_v58 }
  0x5f   : > { %1150 = vmatpush2.msra.mxu0 %v371_v57  ;;  %1060 = vmatprep.subr.mxu1 %v302_v60  ;;  %v417_v57 = vld [vmem:[%s3031_s2 + $0x4e0] sm:$0xff] }
  0x60   : > { %1151 = vmatprep.subr.mxu0 %v370_v59  ;;  %1061 = vmatpush2.msra.mxu1 %v301_v62  ;;  %v416_v62 = vld [vmem:[%s3031_s2 + $0x4d8] sm:$0xff] }
  0x61   : > { %1152 = vmatpush2.msra.mxu0 %v369_v61  ;;  %1062 = vmatprep.subr.mxu1 %v300_v0 }
  0x62   : > { %1153 = vmatprep.subr.mxu0 %v368_v63  ;;  %1063 = vmatpush2.msra.mxu1 %v299_v2 }
  0x63   : > { %1154 = vmatpush2.msra.mxu0 %v367_v1  ;;  %1064 = vmatprep.subr.mxu1 %v298_v4  ;;  %v415_v1 = vld [vmem:[%s3031_s2 + $0x4d0] sm:$0xff]  ;;  %v414_v4 = vld [vmem:[%s3031_s2 + $0x4c8] sm:$0xff] }
  0x64   : > { %1155 = vmatprep.subr.mxu0 %v366_v3  ;;  %1065 = vmatpush2.msra.mxu1 %v297_v6 }
  0x65   : > { %1156 = vmatpush2.msra.mxu0 %v365_v5  ;;  %1066 = vmatprep.subr.mxu1 %v296_v9 }
  0x66   : > { %1157 = vmatprep.subr.mxu0 %v364_v8  ;;  %1067 = vmatpush2.msra.mxu1 %v295_v11 }
  0x67   : > { %1158 = vmatpush2.msra.mxu0 %v363_v10  ;;  %1068 = vmatprep.subr.mxu1 %v294_v13  ;;  %v413_v10 = vld [vmem:[%s3031_s2 + $0x4c0] sm:$0xff] }
  0x68   : > { %1159 = vmatprep.subr.mxu0 %v362_v12  ;;  %1069 = vmatpush2.msra.mxu1 %v293_v15 }
  0x69   : > { %1160 = vmatpush2.msra.mxu0 %v361_v14  ;;  %1196 = vmatprep.subr.mxu1 %v420_v17  ;;  %v412_v14 = vld [vmem:[%s3031_s2 + $0x4b8] sm:$0xff] }
  0x6a   : > { %1161 = vmatprep.subr.mxu0 %v360_v16 }
  0x6b   : > { %1162 = vmatpush2.msra.mxu0 %v359_v18  ;;  %v490_v18 = vadd.s32 640, %v2587_v22 }
  0x6c   : > { %1163 = vmatprep.subr.mxu0 %v358_v19  ;;  %v411_v19 = vld [vmem:[%s3031_s2 + $0x4b0] sm:$0xff] }
  0x6d   : > { %1164 = vmatpush2.msra.mxu0 %v357_v20 }
  0xda   : > { %v603_v30 = vpop.f32.mrf.mxu0 }
  0xdb   : > { %v698_v31 = vpop.f32.mrf.mxu1  ;;  %v822_v32 = vsub.f32 %v603_v30, %v2593_v26 }
  0xdc   : > { %v824_v33 = vsub.f32 %v698_v31, %v2595_v27  ;;  %v605_v34 = vpop.f32.mrf.mxu0 }
  0xdd   : > { %v700_v35 = vpop.f32.mrf.mxu1  ;;  %v823_v36 = vsub.f32 %v605_v34, %v2597_v28  ;;  %v852_v39 = vand.u32 2147483647, %v822_v32 }
  0xde   : > { %v854_v37 = vand.u32 2147483647, %v824_v33  ;;  %v825_v38 = vsub.f32 %v700_v35, %v2599_v29  ;;  %v609_v40 = vpop.f32.mrf.mxu0  ;;  %v409_v33 = vld [vmem:[%s3031_s2 + $0x4a0] sm:$0xff] }
  0xdf   : > { %v704_v41 = vpop.f32.mrf.mxu1  ;;  %v853_v42 = vand.u32 2147483647, %v823_v36  ;;  %v828_v44 = vsub.f32 %v609_v40, %v2593_v26  ;;  %vm882_vm5 = vcmp.lt.f32.partialorder %v852_v39, 0.5  ;;  %v408_v36 = vld [vmem:[%s3031_s2 + $0x498] sm:$0xff] }
  0xe0   : > { %v855_v43 = vand.u32 2147483647, %v825_v38  ;;  %vm884_vm2 = vcmp.lt.f32.partialorder %v854_v37, 0.5  ;;  %v611_v45 = vpop.f32.mrf.mxu0  ;;  %v830_v46 = vsub.f32 %v704_v41, %v2595_v27  ;;  %v2673_v41 = vcvt.s32.f32 %v490_v18  ;;  %v439_v18 = vld [vmem:[%s3031_s2 + $0x590] sm:$0xff] }
  0xe1   : > { %v706_v47 = vpop.f32.mrf.mxu1  ;;  %vm883_vm3 = vcmp.lt.f32.partialorder %v853_v42, 0.5  ;;  %v829_v49 = vsub.f32 %v611_v45, %v2597_v28  ;;  %v858_v53 = vand.u32 2147483647, %v828_v44  ;;  %v406_v44 = vld [vmem:[%s3031_s2 + $0x488] sm:$0xff] }
  0xe2   : > { %vm885_vm4 = vcmp.lt.f32.partialorder %v855_v43, 0.5  ;;  %v831_v50 = vsub.f32 %v706_v47, %v2599_v29  ;;  %1771 = vmatprep.mubr.msk.f32.mxu1 %vm883_vm3, %v2007_v51  ;;  %v860_v54 = vand.u32 2147483647, %v830_v46  ;;  %v615_v55 = vpop.f32.mrf.mxu0 }
  0xe3   : > { %1781 = vmatprep.mubr.msk.f32.mxu0 %vm885_vm4, %v2007_v51  ;;  %v710_v56 = vpop.f32.mrf.mxu1  ;;  %1772 = vmatmul.mubr.msk.f32.vlgmr.msra.gmra.mxu1 %vm882_vm5, %v2007_v51  ;;  %v859_v58 = vand.u32 2147483647, %v829_v49  ;;  %v834_v59 = vsub.f32 %v615_v55, %v2593_v26  ;;  %vm888_vm6 = vcmp.lt.f32.partialorder %v858_v53, 0.5  ;;  %v402_v53 = vld [vmem:[%s3031_s2 + $0x468] sm:$0xff] }
  0xe4   : > { %1782 = vmatmul.mubr.msk.f32.vlgmr.msra.gmra.mxu0 %vm884_vm2, %v2007_v51  ;;  %v861_v60 = vand.u32 2147483647, %v831_v50  ;;  %v836_v61 = vsub.f32 %v710_v56, %v2595_v27  ;;  %1197 = vmatpush1.msra.mxu1 %v419_v48  ;;  %v617_v63 = vpop.f32.mrf.mxu0  ;;  %vm890_vm9 = vcmp.lt.f32.partialorder %v860_v54, 0.5  ;;  %v403_v50 = vld [vmem:[%s3031_s2 + $0x470] sm:$0xff]  ;;  %v401_v54 = vld [vmem:[%s3031_s2 + $0x460] sm:$0xff]  ;;  %v400_v56 = vld [vmem:[%s3031_s2 + $0x458] sm:$0xff] }
  0xe5   : > { %v712_v0 = vpop.f32.mrf.mxu1  ;;  %1198 = vmatprep.subr.mxu1 %v418_v52  ;;  %vm889_vm7 = vcmp.lt.f32.partialorder %v859_v58, 0.5  ;;  %v864_v2 = vand.u32 2147483647, %v834_v59  ;;  %v835_v3 = vsub.f32 %v617_v63, %v2597_v28  ;;  %v398_v58 = vld [vmem:[%s3031_s2 + $0x448] sm:$0xff] }
  0xe6   : > { %vm891_vm8 = vcmp.lt.f32.partialorder %v861_v60, 0.5  ;;  %1199 = vmatpush1.msra.mxu1 %v417_v57  ;;  %v866_v5 = vand.u32 2147483647, %v836_v61  ;;  %v621_v6 = vpop.f32.mrf.mxu0  ;;  %v837_v8 = vsub.f32 %v712_v0, %v2599_v29  ;;  %1773 = vmatprep.mubr.msk.f32.mxu1 %vm889_vm7, %v2007_v51  ;;  %v399_v57 = vld [vmem:[%s3031_s2 + $0x450] sm:$0xff]  ;;  %v397_v60 = vld [vmem:[%s3031_s2 + $0x440] sm:$0xff]  ;;  %v396_v61 = vld [vmem:[%s3031_s2 + $0x438] sm:$0xff] }
  0xe7   : > { %v716_v9 = vpop.f32.mrf.mxu1  ;;  %1200 = vmatprep.subr.mxu1 %v416_v62  ;;  %v865_v11 = vand.u32 2147483647, %v835_v3  ;;  %v840_v12 = vsub.f32 %v621_v6, %v2593_v26  ;;  %1774 = vmatmul.mubr.msk.f32.gmra.mxu1 %vm888_vm6, %v2007_v51  ;;  %vm894_vm10 = vcmp.lt.f32.partialorder %v864_v2, 0.5  ;;  %vm983_vm6 = vcmask 900096   ;;  %v395_v62 = vld [vmem:[%s3031_s2 + $0x430] sm:$0xff]  ;;  %v394_v63 = vld [vmem:[%s3031_s2 + $0x428] sm:$0xff] }
  0xe8   : > { %v842_v13 = vsub.f32 %v716_v9, %v2595_v27  ;;  %1201 = vmatpush1.msra.mxu1 %v415_v1  ;;  %v867_v15 = vand.u32 2147483647, %v837_v8  ;;  %v623_v16 = vpop.f32.mrf.mxu0  ;;  %1783 = vmatprep.mubr.msk.f32.mxu0 %vm891_vm8, %v2007_v51  ;;  %vm896_vm12 = vcmp.lt.f32.partialorder %v866_v5, 0.5  ;;  %v393_v0 = vld [vmem:[%s3031_s2 + $0x420] sm:$0xff]  ;;  %v392_v1 = vld [vmem:[%s3031_s2 + $0x418] sm:$0xff]  ;;  %v391_v2 = vld [vmem:[%s3031_s2 + $0x410] sm:$0xff] }
  0xe9   : > { %v718_v17 = vpop.f32.mrf.mxu1  ;;  %1202 = vmatprep.subr.mxu1 %v414_v4  ;;  %vm895_vm11 = vcmp.lt.f32.partialorder %v865_v11, 0.5  ;;  %v870_v20 = vand.u32 2147483647, %v840_v12  ;;  %v841_v23 = vsub.f32 %v623_v16, %v2597_v28  ;;  %1784 = vmatmul.mubr.msk.f32.gmra.mxu0 %vm890_vm9, %v2007_v51  ;;  %v390_v3 = vld [vmem:[%s3031_s2 + $0x408] sm:$0xff]  ;;  %v389_v4 = vld [vmem:[%s3031_s2 + $0x400] sm:$0xff]  ;;  %vm999_vm8 = vcmask 1045504  }
  0xea   : > { %1203 = vmatpush1.msra.mxu1 %v413_v10  ;;  %vm897_vm13 = vcmp.lt.f32.partialorder %v867_v15, 0.5  ;;  %v872_v25 = vand.u32 2147483647, %v842_v13  ;;  %v627_v30 = vpop.f32.mrf.mxu0  ;;  %v843_v31 = vsub.f32 %v718_v17, %v2599_v29  ;;  %1775 = vmatprep.mubr.msk.f32.mxu1 %vm895_vm11, %v2007_v51  ;;  %v448_v6 = vld [vmem:[%s3031_s2 + $0x5d8] sm:$0x3f]  ;;  %v446_v9 = vld [vmem:[%s3031_s2 + $0x5c8] sm:$0xff] }
  0xeb   : > { %v722_v32 = vpop.f32.mrf.mxu1  ;;  %1204 = vmatprep.subr.mxu1 %v412_v14  ;;  %v871_v34 = vand.u32 2147483647, %v841_v23  ;;  %v846_v35 = vsub.f32 %v627_v30, %v2593_v26  ;;  %1776 = vmatmul.mubr.msk.f32.gmra.mxu1 %vm894_vm10, %v2007_v51  ;;  %vm900_vm14 = vcmp.lt.f32.partialorder %v870_v20, 0.5  ;;  %v407_v26 = vld [vmem:[%s3031_s2 + $0x490] sm:$0xff]  ;;  %v445_v10 = vld [vmem:[%s3031_s2 + $0x5c0] sm:$0xff]  ;;  %v444_v12 = vld [vmem:[%s3031_s2 + $0x5b8] sm:$0xff] }
  0xec   : > { %1205 = vmatpush1.msra.mxu1 %v411_v19  ;;  %v873_v37 = vand.u32 2147483647, %v843_v31  ;;  %v629_v38 = vpop.f32.mrf.mxu0  ;;  %v848_v39 = vsub.f32 %v722_v32, %v2595_v27  ;;  %1785 = vmatprep.mubr.msk.f32.mxu0 %vm897_vm13, %v2007_v51  ;;  %vm902_vm0 = vcmp.lt.f32.partialorder %v872_v25, 0.5  ;;  %v447_v8 = vld [vmem:[%s3031_s2 + $0x5d0] sm:$0x3f]  ;;  %v442_v14 = vld [vmem:[%s3031_s2 + $0x5a8] sm:$0xff] }
  0xed   : > { %v724_v40 = vpop.f32.mrf.mxu1  ;;  %1206 = vmatprep.subr.mxu1 %v410_v24  ;;  %vm901_vm15 = vcmp.lt.f32.partialorder %v871_v34, 0.5  ;;  %v876_v42 = vand.u32 2147483647, %v846_v35  ;;  %v847_v43 = vsub.f32 %v629_v38, %v2597_v28  ;;  %1786 = vmatmul.mubr.msk.f32.gmra.mxu0 %vm896_vm12, %v2007_v51  ;;  %v405_v28 = vld [vmem:[%s3031_s2 + $0x480] sm:$0xff]  ;;  %v443_v13 = vld [vmem:[%s3031_s2 + $0x5b0] sm:$0xff]  ;;  %v440_v17 = vld [vmem:[%s3031_s2 + $0x598] sm:$0xff] }
  0xee   : > { %v849_v27 = vsub.f32 %v724_v40, %v2599_v29  ;;  %1207 = vmatpush1.msra.mxu1 %v409_v33  ;;  %vm903_vm1 = vcmp.lt.f32.partialorder %v873_v37, 0.5  ;;  %v878_v45 = vand.u32 2147483647, %v848_v39  ;;  %1777 = vmatprep.mubr.msk.f32.mxu1 %vm901_vm15, %v2007_v51  ;;  %v2686_v46 = vpop.f32.mrf.mxu0  ;;  %v404_v29 = vld [vmem:[%s3031_s2 + $0x478] sm:$0xff]  ;;  %v441_v15 = vld [vmem:[%s3031_s2 + $0x5a0] sm:$0xff]  ;;  %v438_v19 = vld [vmem:[%s3031_s2 + $0x588] sm:$0xff] }
  0xef   : > { %1208 = vmatprep.subr.mxu1 %v408_v36  ;;  %v877_v47 = vand.u32 2147483647, %v847_v43  ;;  %1778 = vmatmul.mubr.msk.f32.gmra.mxu1 %vm900_vm14, %v2007_v51  ;;  %vm906_vm2 = vcmp.lt.f32.partialorder %v876_v42, 0.5  ;;  %v437_v20 = vld [vmem:[%s3031_s2 + $0x580] sm:$0xff]  ;;  %v436_v24 = vld [vmem:[%s3031_s2 + $0x578] sm:$0xff]  ;;  %v435_v25 = vld [vmem:[%s3031_s2 + $0x570] sm:$0xff] }
  0xf0   : > { %v879_v48 = vand.u32 2147483647, %v849_v27  ;;  %1209 = vmatpush1.msra.mxu1 %v407_v26  ;;  %1787 = vmatprep.mubr.msk.f32.mxu0 %vm903_vm1, %v2007_v51  ;;  %v795_v49 = vpop.f32.mrf.mxu0  ;;  %vm908_vm5 = vcmp.lt.f32.partialorder %v878_v45, 0.5  ;;  %v489_v30 = vadd.s32 512, %v2587_v22  ;;  %v434_v31 = vld [vmem:[%s3031_s2 + $0x568] sm:$0xff]  ;;  %v433_v32 = vld [vmem:[%s3031_s2 + $0x560] sm:$0xff] }
  0xf1   : > { %1210 = vmatprep.subr.mxu1 %v406_v44  ;;  %vm907_vm3 = vcmp.lt.f32.partialorder %v877_v47, 0.5  ;;  %1788 = vmatmul.mubr.msk.f32.gmra.mxu0 %vm902_vm0, %v2007_v51  ;;  %v827_v52 = vsub.f32 %v795_v49, %v2673_v41  ;;  %v432_v34 = vld [vmem:[%s3031_s2 + $0x558] sm:$0xff]  ;;  %v431_v22 = vld [vmem:[%s3031_s2 + $0x550] sm:$0xff]  ;;  %v430_v36 = vld [vmem:[%s3031_s2 + $0x548] sm:$0xff] }
  0xf2   : > { %vm909_vm4 = vcmp.lt.f32.partialorder %v879_v48, 0.5  ;;  %1211 = vmatpush1.msra.mxu1 %v405_v28  ;;  %1779 = vmatprep.mubr.msk.f32.mxu1 %vm907_vm3, %v2007_v51  ;;  %v2752_v5 = vpop.f32.mrf.mxu0  ;;  %v2808_v35 = vcvt.s32.f32 %v489_v30  ;;  %v429_v38 = vld [vmem:[%s3031_s2 + $0x540] sm:$0xff]  ;;  %v428_v40 = vld [vmem:[%s3031_s2 + $0x538] sm:$0xff]  ;;  %v427_v42 = vld [vmem:[%s3031_s2 + $0x530] sm:$0xff]  ;;  %vm1404_vm3 = vcmask 1042432  }
  0xf3   : > { %1212 = vmatprep.subr.mxu1 %v404_v29  ;;  %v857_v55 = vand.u32 2147483647, %v827_v52  ;;  %1780 = vmatmul.mubr.msk.f32.gmra.mxu1 %vm906_vm2, %v2007_v51  ;;  %v426_v27 = vld [vmem:[%s3031_s2 + $0x528] sm:$0xff]  ;;  %v425_v45 = vld [vmem:[%s3031_s2 + $0x520] sm:$0xff]  ;;  %v423_v29 = vld [vmem:[%s3031_s2 + $0x510] sm:$0xff]  ;;  %vm2008_vm2 = vmmov 0  }
  0xf4   : > { %1213 = vmatpush1.msra.mxu1 %v403_v50  ;;  %1789 = vmatprep.mubr.msk.f32.mxu0 %vm909_vm4, %v2007_v51  ;;  %v801_v11 = vpop.f32.mrf.mxu0  ;;  %v826_v26 = vsub.f32 %v2686_v46, %v2808_v35  ;;  %v424_v46 = vld [vmem:[%s3031_s2 + $0x518] sm:$0xff]  ;;  %v832_v48 = vsub.f32 %v2752_v5, %v2808_v35  ;;  %v422_v50 = vld [vmem:[%s3031_s2 + $0x508] sm:$0xff]  ;;  %vm1401_vm4 = vcmask 285696  }
  0xf5   : > { %1214 = vmatprep.subr.mxu1 %v402_v53  ;;  %vm887_vm7 = vcmp.lt.f32.partialorder %v857_v55, 0.5  ;;  %1790 = vmatmul.mubr.msk.f32.gmra.mxu0 %vm908_vm5, %v2007_v51  ;;  %v833_v37 = vsub.f32 %v801_v11, %v2673_v41  ;;  %v421_v53 = vld [vmem:[%s3031_s2 + $0x500] sm:$0xff]  ;;  %v471_v30 = vld [vmem:[%s3033_s4 + $0xa8] sm:$0xff]  ;;  %vm1484_vm5 = vcmask 64512  }
  0xf6   : > { %1215 = vmatpush1.msra.mxu1 %v401_v54  ;;  %v1746_v59 = vsel %vm887_vm7, 1.0, %v2006_v7  ;;  %v2778_v16 = vpop.f32.mrf.mxu0  ;;  %v856_v47 = vand.u32 2147483647, %v826_v26  ;;  %v862_v55 = vand.u32 2147483647, %v832_v48  ;;  %v478_v11 = vld [vmem:[%s3033_s4 + $0xe0] sm:$0xff] }
  0xf7   : > { %1216 = vmatprep.subr.mxu1 %v400_v56  ;;  %1793 = vmatprep.mubr.msk.f32.mxu1 %vm983_vm6, %v1746_v59  ;;  %v863_v43 = vand.u32 2147483647, %v833_v37  ;;  %v467_v37 = vld [vmem:[%s3033_s4 + $0x88] sm:$0xff]  ;;  %v974_v48 = vshrl.u32 %v484_v21, 7  ;;  %vm1634_vm7 = vcmask 24576  }
  0xf8   : > { %1217 = vmatpush1.msra.mxu1 %v399_v57  ;;  %v807_v23 = vpop.f32.mrf.mxu0  ;;  %vm886_vm10 = vcmp.lt.f32.partialorder %v856_v47, 0.5  ;;  %v838_v57 = vsub.f32 %v2778_v16, %v2808_v35  ;;  %vm892_vm12 = vcmp.lt.f32.partialorder %v862_v55, 0.5  ;;  %v460_v16 = vld [vmem:[%s3033_s4 + $0x50] sm:$0xff]  ;;  %v2968_v26 = vld [vmem:[%s3034_s5 + $0x8] sm:$0x3] }
  0xf9   : > { %1218 = vmatprep.subr.mxu1 %v398_v58  ;;  %v839_v44 = vsub.f32 %v807_v23, %v2673_v41  ;;  %vm893_vm9 = vcmp.lt.f32.partialorder %v863_v43, 0.5  ;;  %v457_v23 = vld [vmem:[%s3033_s4 + $0x38] sm:$0xff] }
  0xfa   : > { %1219 = vmatpush1.msra.mxu1 %v397_v60  ;;  %v811_v33 = vpop.f32.mrf.mxu0  ;;  %v1752_v56 = vsel %vm893_vm9, 1.0, %v2006_v7 }
  0xfb   : > { %1220 = vmatprep.subr.mxu1 %v396_v61  ;;  %v869_v49 = vand.u32 2147483647, %v839_v44  ;;  %v868_v61 = vand.u32 2147483647, %v838_v57 }
  0xfc   : > { %1221 = vmatpush1.msra.mxu1 %v395_v62  ;;  %v813_v39 = vpop.f32.mrf.mxu0  ;;  %v844_v62 = vsub.f32 %v811_v33, %v2808_v35  ;;  %v454_v33 = vld [vmem:[%s3033_s4 + $0x20] sm:$0xff] }
  0xfd   : > { %1222 = vmatprep.subr.mxu1 %v394_v63  ;;  %v845_v52 = vsub.f32 %v813_v39, %v2673_v41  ;;  %vm899_vm11 = vcmp.lt.f32.partialorder %v869_v49, 0.5  ;;  %vm898_vm14 = vcmp.lt.f32.partialorder %v868_v61, 0.5  ;;  %v466_v39 = vld [vmem:[%s3033_s4 + $0x80] sm:$0xff] }
  0xfe   : > { %1223 = vmatpush1.msra.mxu1 %v393_v0  ;;  %v817_v28 = vpop.f32.mrf.mxu0  ;;  %v1758_v60 = vsel %vm899_vm11, 1.0, %v2006_v7 }
  0xff   : > { %1224 = vmatprep.subr.mxu1 %v392_v1  ;;  %v875_v58 = vand.u32 2147483647, %v845_v52  ;;  %v850_v1 = vsub.f32 %v817_v28, %v2808_v35  ;;  %v453_v35 = vld [vmem:[%s3033_s4 + $0x18] sm:$0xff]  ;;  %v975_v52 = vsub.s32 0, %v974_v48 }
 0x100   : > { %1225 = vmatpush1.msra.mxu1 %v391_v2  ;;  %v819_v54 = vpop.f32.mrf.mxu0  ;;  %v481_v2 = vld [vmem:[%s3033_s4 + $0xf8] sm:$0xff] }
 0x101   : > { %1226 = vmatprep.subr.mxu1 %v390_v3  ;;  %v851_v59 = vsub.f32 %v819_v54, %v2673_v41  ;;  %vm905_vm13 = vcmp.lt.f32.partialorder %v875_v58, 0.5  ;;  %v874_v41 = vand.u32 2147483647, %v844_v62  ;;  %v465_v3 = vld [vmem:[%s3033_s4 + $0x78] sm:$0xff]  ;;  %1811 = vmatprep.subr.mxu0 %v481_v2  ;;  %v979_v54 = vsub.s32 1, %v974_v48 }
 0x102   : > { %1227 = vmatpush1.msra.mxu1 %v389_v4  ;;  %v1764_v0 = vsel %vm905_vm13, 1.0, %v2006_v7  ;;  %v480_v4 = vld [vmem:[%s3033_s4 + $0xf0] sm:$0xff]  ;;  %1812 = vmatpush3.msra.mxu0 %v465_v3 }
 0x103   : > { %1791 = vmatprep.subr.msk.mxu1 %vm999_vm8, %v448_v6  ;;  %v881_v63 = vand.u32 2147483647, %v851_v59  ;;  %v464_v6 = vld [vmem:[%s3033_s4 + $0x70] sm:$0xff]  ;;  %vm904_vm0 = vcmp.lt.f32.partialorder %v874_v41, 0.5  ;;  %1813 = vmatprep.subr.mxu0 %v480_v4 }
 0x104   : > { %1792 = vmatpush2.msk.msra.mxu1 %vm999_vm8, %v447_v8  ;;  %v880_v8 = vand.u32 2147483647, %v850_v1  ;;  %1814 = vmatpush3.msra.mxu0 %v464_v6 }
 0x105   : > { %1234 = vmatprep.subr.mxu1 %v446_v9  ;;  %vm911_vm15 = vcmp.lt.f32.partialorder %v881_v63, 0.5  ;;  %v479_v9 = vld [vmem:[%s3033_s4 + $0xe8] sm:$0xff] }
 0x106   : > { %1235 = vmatpush2.msra.mxu1 %v445_v10  ;;  %v1770_v5 = vsel %vm911_vm15, 1.0, %v2006_v7  ;;  %v463_v10 = vld [vmem:[%s3033_s4 + $0x68] sm:$0xff]  ;;  %1815 = vmatprep.subr.mxu0 %v479_v9  ;;  %vm910_vm1 = vcmp.lt.f32.partialorder %v880_v8, 0.5 }
 0x107   : > { %1236 = vmatprep.subr.mxu1 %v444_v12  ;;  %v462_v12 = vld [vmem:[%s3033_s4 + $0x60] sm:$0xff]  ;;  %1816 = vmatpush3.msra.mxu0 %v463_v10 }
 0x108   : > { %1237 = vmatpush2.msra.mxu1 %v443_v13  ;;  %v477_v13 = vld [vmem:[%s3033_s4 + $0xd8] sm:$0xff]  ;;  %1817 = vmatprep.subr.mxu0 %v478_v11 }
 0x109   : > { %1238 = vmatprep.subr.mxu1 %v442_v14  ;;  %v461_v14 = vld [vmem:[%s3033_s4 + $0x58] sm:$0xff]  ;;  %1818 = vmatpush3.msra.mxu0 %v462_v12 }
 0x10a   : > { %1239 = vmatpush2.msra.mxu1 %v441_v15  ;;  %v476_v15 = vld [vmem:[%s3033_s4 + $0xd0] sm:$0xff]  ;;  %1819 = vmatprep.subr.mxu0 %v477_v13 }
 0x10b   : > { %1240 = vmatprep.subr.mxu1 %v440_v17  ;;  %1820 = vmatpush3.msra.mxu0 %v461_v14  ;;  %v459_v17 = vld [vmem:[%s3033_s4 + $0x48] sm:$0xff] }
 0x10c   : > { %1241 = vmatpush2.msra.mxu1 %v439_v18  ;;  %1821 = vmatprep.subr.mxu0 %v476_v15  ;;  %v474_v18 = vld [vmem:[%s3033_s4 + $0xc0] sm:$0xff] }
 0x10d   : > { %1242 = vmatprep.subr.mxu1 %v438_v19  ;;  %1822 = vmatpush3.msra.mxu0 %v460_v16  ;;  %v458_v19 = vld [vmem:[%s3033_s4 + $0x40] sm:$0xff] }
 0x10e   : > { %1243 = vmatpush2.msra.mxu1 %v437_v20  ;;  %v473_v20 = vld [vmem:[%s3033_s4 + $0xb8] sm:$0xff] }
 0x10f   : > { %1244 = vmatprep.subr.mxu1 %v436_v24  ;;  %v472_v24 = vld [vmem:[%s3033_s4 + $0xb0] sm:$0xff] }
 0x110   : > { %1245 = vmatpush2.msra.mxu1 %v435_v25  ;;  %v456_v25 = vld [vmem:[%s3033_s4 + $0x30] sm:$0xff] }
 0x111   : > { %1246 = vmatprep.subr.mxu1 %v434_v31  ;;  %v455_v31 = vld [vmem:[%s3033_s4 + $0x28] sm:$0xff] }
 0x112   : > { %1247 = vmatpush2.msra.mxu1 %v433_v32  ;;  %v470_v32 = vld [vmem:[%s3033_s4 + $0xa0] sm:$0xff] }
 0x113   : > { %1248 = vmatprep.subr.mxu1 %v432_v34  ;;  %v469_v34 = vld [vmem:[%s3033_s4 + $0x98] sm:$0xff] }
 0x114   : > { %1249 = vmatpush2.msra.mxu1 %v431_v22  ;;  %v468_v22 = vld [vmem:[%s3033_s4 + $0x90] sm:$0xff] }
 0x115   : > { %1250 = vmatprep.subr.mxu1 %v430_v36  ;;  %v452_v36 = vld [vmem:[%s3033_s4 + $0x10] sm:$0xff] }
 0x116   : > { %1251 = vmatpush2.msra.mxu1 %v429_v38  ;;  %v451_v38 = vld [vmem:[%s3033_s4 + $0x8] sm:$0xff] }
 0x117   : > { %1252 = vmatprep.subr.mxu1 %v428_v40  ;;  %v450_v40 = vld [vmem:[%s3033_s4] sm:$0xff] }
 0x118   : > { %1253 = vmatpush2.msra.mxu1 %v427_v42  ;;  %v1302_v42 = vrot.slane %v2968_v26, 1 }
 0x119   : > { %1254 = vmatprep.subr.mxu1 %v426_v27 }
 0x11a   : > { %1255 = vmatpush2.msra.mxu1 %v425_v45  ;;  %1892 = vpush %v1302_v42 }
 0x11b   : > { %1256 = vmatprep.subr.mxu1 %v424_v46 }
 0x11c   : > { %1257 = vmatpush2.msra.mxu1 %v423_v29 }
 0x11d   : > { %1258 = vmatprep.subr.mxu1 %v422_v50 }
 0x11e   : > { %1259 = vmatpush2.msra.mxu1 %v421_v53  ;;  %v449_v53 = vld [vmem:[%s3032_s3] sm:$0x3] }
 0x11f   : > { %1794 = vmatmul.mubr.msk.f32.vlgmr.msra.gmra.mxu1 %vm886_vm10, %v2007_v51  ;;  %v976_v57 = vrot.slane %v449_v53, %v975_v52  ;;  %v980_v58 = vrot.slane %v449_v53, %v979_v54 }
 0x120   : > { %1795 = vmatprep.mubr.msk.f32.mxu1 %vm983_vm6, %v1752_v56 }
 0x123   : > { %1796 = vmatmul.mubr.msk.f32.gmra.mxu1 %vm892_vm12, %v2007_v51 }
 0x124   : > { %1797 = vmatprep.mubr.msk.f32.mxu1 %vm983_vm6, %v1758_v60 }
 0x127   : > { %1798 = vmatmul.mubr.msk.f32.gmra.mxu1 %vm898_vm14, %v2007_v51 }
 0x128   : > { %1799 = vmatprep.mubr.msk.f32.mxu1 %vm983_vm6, %v1764_v0 }
 0x12b   : > { %1800 = vmatmul.mubr.msk.f32.gmra.mxu1 %vm904_vm0, %v2007_v51 }
 0x12c   : > { %1801 = vmatprep.mubr.msk.f32.mxu1 %vm983_vm6, %v1770_v5  ;;  %vm1558_vm6 = vcmask 261120  }
 0x12f   : > { %1802 = vmatmul.mubr.msk.f32.gmra.mxu1 %vm910_vm1, %v2007_v51  ;;  %v475_v51 = vld [vmem:[%s3033_s4 + $0xc8] sm:$0xff] }
 0x130   : > { %1823 = vmatprep.subr.mxu0 %v475_v51 }
 0x131   : > { %1824 = vmatpush3.msra.mxu0 %v459_v17 }
 0x132   : > { %1825 = vmatprep.subr.mxu0 %v474_v18 }
 0x133   : > { %1826 = vmatpush3.msra.mxu0 %v458_v19 }
 0x134   : > { %1827 = vmatprep.subr.mxu0 %v473_v20 }
 0x135   : > { %1828 = vmatpush3.msra.mxu0 %v457_v23 }
 0x136   : > { %1829 = vmatprep.subr.mxu0 %v472_v24 }
 0x137   : > { %1830 = vmatpush3.msra.mxu0 %v456_v25 }
 0x138   : > { %1831 = vmatprep.subr.mxu0 %v471_v30 }
 0x139   : > { %1832 = vmatpush3.msra.mxu0 %v455_v31 }
 0x13a   : > { %1833 = vmatprep.subr.mxu0 %v470_v32 }
 0x13b   : > { %1834 = vmatpush3.msra.mxu0 %v454_v33 }
 0x13c   : > { %1835 = vmatprep.subr.mxu0 %v469_v34 }
 0x13d   : > { %1836 = vmatpush3.msra.mxu0 %v453_v35 }
 0x13e   : > { %1837 = vmatprep.subr.mxu0 %v468_v22 }
 0x13f   : > { %1838 = vmatpush3.msra.mxu0 %v452_v36 }
 0x140   : > { %1839 = vmatprep.subr.mxu0 %v467_v37 }
 0x141   : > { %1840 = vmatpush3.msra.mxu0 %v451_v38 }
 0x142   : > { %1841 = vmatprep.subr.mxu0 %v466_v39 }
 0x143   : > { %1842 = vmatpush3.msra.mxu0 %v450_v40 }
 0x144   : > { %1868 = vmatprep.subr.mxu0 %v2006_v7 }
 0x14b   : > { %s1893_s20 = spop %1892 }
 0x1a3   : > { %v1072_v43 = vpop.f32.mrf.mxu1 }
 0x1a4   : > { %v1167_v46 = vpop.f32.mrf.mxu0  ;;  %v1073_v61 = vadd.f32 %v1072_v43, %v976_v57 }
 0x1a5   : > { %v1074_v27 = vpop.f32.mrf.mxu1 }
 0x1a6   : > { %v1169_v29 = vpop.f32.mrf.mxu0  ;;  %v1075_v62 = vadd.f32 %v1074_v27, %v980_v58  ;;  %v1168_v21 = vadd.f32 %v1167_v46, %v1073_v61 }
 0x1a7   : > { %v1078_v44 = vpop.f32.mrf.mxu1 }
 0x1a8   : > { %v1079_v41 = vadd.f32 %v1078_v44, %v976_v57  ;;  %v1170_v2 = vadd.f32 %v1169_v29, %v1075_v62 }
 0x1a9   : > { %v1080_v45 = vpop.f32.mrf.mxu1  ;;  %v1173_v49 = vpop.f32.mrf.mxu0 }
 0x1aa   : > { %v1081_v3 = vadd.f32 %v1080_v45, %v980_v58  ;;  %v1174_v9 = vadd.f32 %v1173_v49, %v1079_v41 }
 0x1ab   : > { %v1084_v28 = vpop.f32.mrf.mxu1  ;;  %v1175_v55 = vpop.f32.mrf.mxu0 }
 0x1ac   : > { %v1085_v10 = vadd.f32 %v1084_v28, %v976_v57  ;;  %v1176_v12 = vadd.f32 %v1175_v55, %v1081_v3  ;;  %v482_v55 = vld [vmem:[%s3034_s5] sm:$0xff]  ;;  %v1304_v3 = vstv %s1893_s20 }
 0x1ad   : > { %v1086_v47 = vpop.f32.mrf.mxu1  ;;  %v1179_v59 = vpop.f32.mrf.mxu0 }
 0x1ae   : > { %v1087_v13 = vadd.f32 %v1086_v47, %v980_v58  ;;  %v1180_v19 = vadd.f32 %v1179_v59, %v1085_v10 }
 0x1af   : > { %v1090_v50 = vpop.f32.mrf.mxu1  ;;  %v1181_v63 = vpop.f32.mrf.mxu0 }
 0x1b0   : > { %v1091_v20 = vadd.f32 %v1090_v50, %v976_v57  ;;  %v1182_v24 = vadd.f32 %v1181_v63, %v1087_v13  ;;  %v2010_v13 = vmov 1  }
 0x1b1   : > { %v1092_v56 = vpop.f32.mrf.mxu1  ;;  %v1185_v4 = vpop.f32.mrf.mxu0 }
 0x1b2   : > { %v1093_v25 = vadd.f32 %v1092_v56, %v980_v58  ;;  %v1186_v22 = vadd.f32 %v1185_v4, %v1091_v20  ;;  %v2009_v56 = vmov 35  }
 0x1b3   : > { %v1096_v60 = vpop.f32.mrf.mxu1  ;;  %v1187_v15 = vpop.f32.mrf.mxu0  ;;  %1938 = vset.pattern.permute.xlu0 %v2009_v56 }
 0x1b4   : > { %v1097_v36 = vadd.f32 %v1096_v60, %v976_v57  ;;  %v1188_v38 = vadd.f32 %v1187_v15, %v1093_v25  ;;  %1398 = vperm.xlu0 %1938, %v482_v55  }
 0x1b5   : > { %v1098_v0 = vpop.f32.mrf.mxu1  ;;  %v1191_v31 = vpop.f32.mrf.mxu0 }
 0x1b6   : > { %v1099_v39 = vadd.f32 %v1098_v0, %v980_v58  ;;  %v1192_v28 = vadd.f32 %v1191_v31, %v1097_v36 }
 0x1b7   : > { %v1193_v42 = vpop.f32.mrf.mxu0 }
 0x1b8   : > { %v1194_v47 = vadd.f32 %v1193_v42, %v1099_v39  ;;  %1939 = vset.pattern.permute.xlu0 %v2010_v13 }
 0x1b9   : > { %1480 = vperm.xlu0 %1939, %v2968_v26  }
 0x1df   : > { %v1262_v1 = vpop.f32.mrf.mxu1 }
 0x1e0   : > { %v1263_v5 = vadd.f32 %v1262_v1, %v1168_v21 }
 0x1e1   : > { %v1264_v6 = vpop.f32.mrf.mxu1 }
 0x1e2   : > { %v1265_v8 = vadd.f32 %v1264_v6, %v1170_v2  ;;  %v1291_v16 = vmax.f32 %v1263_v5, 0.0 }
 0x1e3   : > { %v1268_v11 = vpop.f32.mrf.mxu1 }
 0x1e4   : > { %v1292_v14 = vmax.f32 %v1265_v8, 0.0  ;;  %v1269_v51 = vadd.f32 %v1268_v11, %v1174_v9 }
 0x1e5   : > { %v1270_v17 = vpop.f32.mrf.mxu1 }
 0x1e6   : > { %v1271_v18 = vadd.f32 %v1270_v17, %v1176_v12  ;;  %1370 = vmatprep.mubr.f32.mxu0 %v1292_v14  ;;  %v1293_v32 = vmax.f32 %v1269_v51, 0.0 }
 0x1e7   : > { %v1274_v23 = vpop.f32.mrf.mxu1  ;;  %1371 = vmatmul.mubr.f32.vlgmr.msra.gmra.mxu0 %v1291_v16 }
 0x1e8   : > { %v1294_v30 = vmax.f32 %v1271_v18, 0.0  ;;  %v1275_v33 = vadd.f32 %v1274_v23, %v1180_v19 }
 0x1e9   : > { %v1276_v34 = vpop.f32.mrf.mxu1 }
 0x1ea   : > { %v1277_v35 = vadd.f32 %v1276_v34, %v1182_v24  ;;  %1375 = vmatprep.mubr.f32.mxu0 %v1294_v30  ;;  %v1295_v43 = vmax.f32 %v1275_v33, 0.0 }
 0x1eb   : > { %v1280_v37 = vpop.f32.mrf.mxu1  ;;  %1376 = vmatmul.mubr.f32.gmra.mxu0 %v1293_v32 }
 0x1ec   : > { %v1296_v40 = vmax.f32 %v1277_v35, 0.0  ;;  %v1281_v27 = vadd.f32 %v1280_v37, %v1186_v22 }
 0x1ed   : > { %v1282_v44 = vpop.f32.mrf.mxu1 }
 0x1ee   : > { %v1283_v45 = vadd.f32 %v1282_v44, %v1188_v38  ;;  %1380 = vmatprep.mubr.f32.mxu0 %v1296_v40  ;;  %v1297_v29 = vmax.f32 %v1281_v27, 0.0 }
 0x1ef   : > { %v1286_v46 = vpop.f32.mrf.mxu1  ;;  %1381 = vmatmul.mubr.f32.gmra.mxu0 %v1295_v43 }
 0x1f0   : > { %v1298_v48 = vmax.f32 %v1283_v45, 0.0  ;;  %v1287_v49 = vadd.f32 %v1286_v46, %v1192_v28 }
 0x1f1   : > { %v1288_v50 = vpop.f32.mrf.mxu1 }
 0x1f2   : > { %v1289_v52 = vadd.f32 %v1288_v50, %v1194_v47  ;;  %1385 = vmatprep.mubr.f32.mxu0 %v1298_v48  ;;  %v1299_v54 = vmax.f32 %v1287_v49, 0.0 }
 0x1f3   : > { %1386 = vmatmul.mubr.f32.gmra.mxu0 %v1297_v29 }
 0x1f4   : > { %v1300_v53 = vmax.f32 %v1289_v52, 0.0 }
 0x1f6   : > { %1390 = vmatprep.mubr.f32.mxu0 %v1300_v53 }
 0x1f7   : > { %1391 = vmatmul.mubr.f32.gmra.mxu0 %v1299_v54 }
 0x1f8   : > { %1878 = vmatprep.mubr.msk.f32.mxu0 %vm2008_vm2, %v2006_v7 }
 0x22f   : > { %v1399_v14 = vpop.permute.xlu0 %1398 }
 0x234   : > { %v1481_v19 = vpop.permute.xlu0 %1480 }
 0x235   : > { %v1482_v20 = vrot.slane %v1481_v19, 1 }
 0x2a7   : > { %v1843_v57 = vpop.f32.mrf.mxu0 }
 0x2a9   : > { %v1844_v58 = vpop.f32.mrf.mxu0 }
 0x2aa   : > { %v1845_v9 = vadd.f32 %v1844_v58, %v1843_v57 }
 0x2ab   : > { %v1846_v59 = vpop.f32.mrf.mxu0 }
 0x2ac   : > { %v1373_v12 = vadd.f32 %v1845_v9, %v1304_v3 }
 0x2ad   : > { %v1847_v60 = vpop.f32.mrf.mxu0 }
 0x2ae   : > { %v1848_v6 = vadd.f32 %v1847_v60, %v1846_v59 }
 0x2af   : > { %v1849_v61 = vpop.f32.mrf.mxu0 }
 0x2b0   : > { %v1378_v11 = vadd.f32 %v1848_v6, %v1304_v3 }
 0x2b1   : > { %v1850_v62 = vpop.f32.mrf.mxu0 }
 0x2b2   : > { %v1851_v4 = vadd.f32 %v1850_v62, %v1849_v61 }
 0x2b3   : > { %v1852_v63 = vpop.f32.mrf.mxu0 }
 0x2b4   : > { %v1383_v10 = vadd.f32 %v1851_v4, %v1304_v3 }
 0x2b5   : > { %v1853_v0 = vpop.f32.mrf.mxu0 }
 0x2b6   : > { %v1854_v1 = vadd.f32 %v1853_v0, %v1852_v63 }
 0x2b7   : > { %v1855_v21 = vpop.f32.mrf.mxu0 }
 0x2b8   : > { %v1388_v8 = vadd.f32 %v1854_v1, %v1304_v3 }
 0x2b9   : > { %v1856_v41 = vpop.f32.mrf.mxu0 }
 0x2ba   : > { %v1857_v2 = vadd.f32 %v1856_v41, %v1855_v21 }
 0x2bc   : > { %v1393_v5 = vadd.f32 %v1857_v2, %v1304_v3 }
 0x2be   : > { %1869 = vmatpush3.msk.msra.mxu0 %vm1404_vm3, %v1393_v5  ;;  %v1557_v18 = vrot.slane %v1393_v5, 3 }
 0x2bf   : > { %1870 = vmatprep.subr.mxu0 %v2006_v7 }
 0x2c0   : > { %1871 = vmatpush3.msra.mxu0 %v1388_v8 }
 0x2c1   : > { %1872 = vmatprep.subr.mxu0 %v2006_v7 }
 0x2c2   : > { %1873 = vmatpush3.msra.mxu0 %v1383_v10 }
 0x2c3   : > { %1874 = vmatprep.subr.mxu0 %v2006_v7 }
 0x2c4   : > { %1875 = vmatpush3.msra.mxu0 %v1378_v11 }
 0x2c5   : > { %1876 = vmatprep.subr.mxu0 %v2006_v7 }
 0x2c6   : > { %1877 = vmatpush3.msra.mxu0 %v1373_v12 }
 0x2c7   : > { %1879 = vmatmul.mubr.msk.f32.vlgmr.msra.gmra.mxu0 %vm1401_vm4, %v482_v55  ;;  %1881 = vmatprep.subr.mxu0 %v2006_v7 }
 0x2c8   : > { %1883 = vmatprep.mubr.msk.f32.mxu0 %vm2008_vm2, %v2006_v7 }
 0x387   : > { %v1474_v15 = vpop.f32.mrf.mxu0 }
 0x388   : > { %v1475_v16 = vadd.f32 %v1474_v15, %v1399_v14 }
 0x389   : > { %v1880_v51 = vpop.f32.mrf.mxu0 }
 0x38a   : > { %v1478_v17 = vmax.f32 %v1475_v16, 0.0 }
 0x38c   : > { %1882 = vmatpush3.msra.mxu0 %v1478_v17 }
 0x38d   : > { %1884 = vmatmul.mubr.msk.f32.vlgmr.msra.gmra.mxu0 %vm1484_vm5, %v2968_v26  ;;  %1886 = vmatprep.subr.mxu0 %v2006_v7 }
 0x38e   : > { %1887 = vmatpush3.xpose.msk.msra.mxu0 %vm1558_vm6, %v1557_v18  ;;  %1888 = vmatprep.mubr.msk.f32.mxu0 %vm2008_vm2, %v2006_v7 }
 0x44d   : > { %v1553_v23 = vpop.f32.mrf.mxu0 }
 0x44e   : > { %v1554_v24 = vadd.f32 %v1553_v23, %v1482_v20 }
 0x44f   : > { %v1885_v25 = vpop.f32.mrf.mxu0 }
 0x450   : > { %1889 = vmatmul.mubr.msk.f32.vlgmr.msra.gmra.mxu0 %vm1558_vm6, %v1554_v24 }
 0x510   : > { %v1630_v30 = vpop.f32.mrf.mxu0 }
 0x511   : > { %v1635_v31 = vsel %vm1634_vm7, %v1630_v30, -inf }
 0x512   : > { %1636 = vmax.xlane.f32.xlu1 %v1635_v31  ;;  %v1890_v26 = vpop.f32.mrf.mxu0 }
 0x59b   : > { %v1637_v32 = vpop.xlane.xlu1 %1636 }
 0x59c   : > { %v1638_v33 = vsub.f32 %v1630_v30, %v1637_v32 }
 0x59e   : > { %v1639_v34 = vmul.f32 1.442695, %v1638_v33 }
 0x5a0   : > { %1940 = vpow2.f32 %v1639_v34 }
 0x5ad   : > { %v1941_v35 = vpop.eup %1940 }
 0x5ae   : > { %v1641_v7 = vsel %vm1634_vm7, %v1941_v35, 0.0 }
 0x5af   : > { %1642 = vadd.xlane.f32.xlu1 %v1641_v7 }
 0x638   : > { %v1643_v22 = vpop.xlane.xlu1 %1642 }
 0x639   : > { %1942 = vrcp.f32 %v1643_v22 }
 0x646   : > { %v1943_v36 = vpop.eup %1942 }
 0x647   : > { %v1645_v37 = vmul.f32 %v1943_v36, %v1941_v35 }
 0x649   : > { %1646 = vst.msk [vmem:[%s243_s29] sm:$0x1] %vm1634_vm7, %v1645_v37 }
 0x64a   : > { %1957 = shalt.err (!%p1954_p3)
}
 0x64b   : > { %s1958_s17 = scalar_lea.hbm %s1658_s12, 16  ;;  %s1962_s20 = scalar_lea.hbm %s3035_s6, 32 }
 0x64c   : > { %p1959_p4 = scmp.ne.s32.totalorder %s1658_s12, %s1958_s17  ;;  %p1963_p9 = scmp.lt.s32.totalorder %s1658_s12, %s3035_s6 }
 0x64d   : > { %p1964_p10 = scmp.lt.s32.totalorder %s1962_s20, %s1958_s17 }
 0x64e   : > { %p1960_p7 = pnand %p1959_p4, %p2085_p5 }
 0x64f   : > { %p1965_p11 = por %p1964_p10, %p1963_p9 }
 0x650   : > { %p1961_p8 = pneg %p1960_p7 }
 0x652   : > { %p1966_p12 = pnand %p1965_p11, %p1961_p8 }
 0x654   : > { %1969 = shalt.err (!%p1966_p12)
}
 0x655   : > { %1894 = dma.vmem_to_hbm [thread:$0]  (%p2085_p5), %s1661_s9, 16, %s1658_s12, %s1648_s13  }
 0x656 PF: > { %p1900_p13 = scmp.ge.s32.totalorder %s2004_s24, 2  ;;  %s1672_s29 = sand.u32 1, %s1992_s21  }
 0x657   : > { %s1673_s10 = scalar_lea.sflag [#allocation3], %s1672_s29 }
 0x658   : > { %p1897_p0 = pnand %p1900_p13, %p2089_p6 }
 0x65a   : > { %p1898_p1 = pneg %p1897_p0 }
 0x65c   : > { %1987 = dma.done.wait (%p1898_p1), %s1673_s10, 16  }
 0x65d   : > { %1989 = vsyncadd (%p1898_p1), %s1673_s10, 4294967280  ;;  %p16_p2 = scmp.ge.s32.totalorder %s2072_s27, 4   ;;  %s3038_s21 = smov %s1996_s22 }
 0x65e   : > { %s3039_s22 = smov %s2000_s23  ;;  %s3040_s23 = smov %s2083_s30 }
 0x65f   : > { %s3041_s24 = smov %s2072_s27  ;;  %18 = sbr.rel (!%p16_p2) target bundleno = 3 (0x3), region = 79 }
 0x664   :  { %1677 = vsyncpa [#allocation3], 1 }
 0x665   :  { %1679 = vsyncpa [#allocation3 + $0x1], 1 }

</bundles_post_ra>
